<compile_context>
chip_gen: v7x
topology: tpu7x:2x2x1
jax: 0.10.0
libtpu: 0.0.40
codegen_flags: <defaults>
</compile_context>

<pallas_src>
import functools

import jax
import jax.numpy as jnp
import numpy as np
from jax import lax
from jax.experimental import pallas as pl
from jax.experimental.pallas import tpu as pltpu

LANE = 128
SUBLANE = 8


def _round_up(x, m):
    return (x + m - 1) // m * m


def lstm_fc_kernel(xg_ref, w_hh_ref, w_fc_ref, b_fc_ref, out_ref,
                   h_ref, c_ref, *, unroll):
    """One (batch tile, time chunk) grid step of the LSTM recurrence + final FC.

    xg_ref:   (Tc, BT, 4*Hp)  pre-projected gates for this time chunk (stream dtype)
    w_hh_ref: (Hp, 4*Hp)      hidden->gates weights (stream dtype, gate-wise lane padded)
    w_fc_ref: (Hp, Op)        final linear weights (stream dtype, lane padded)
    b_fc_ref: (1, Op)         final linear bias (f32, lane padded)
    out_ref:  (BT, Op)        logits; written only on the last time chunk
    h_ref/c_ref: (BT, Hp) f32 VMEM scratch carrying state across time chunks
    """
    t_chunk = pl.program_id(1)
    n_chunks = pl.num_programs(1)
    Tc = xg_ref.shape[0]
    Hp = w_hh_ref.shape[0]

    @pl.when(t_chunk == 0)
    def _():
        h_ref[...] = jnp.zeros_like(h_ref)
        c_ref[...] = jnp.zeros_like(c_ref)

    w_hh = w_hh_ref[...]              # hoisted: resident for the whole chunk
    mxu_dtype = w_hh.dtype

    def step(t, carry):
        h, c = carry                  # f32 state; only the MXU operands get cast
        gates = (xg_ref[t].astype(jnp.float32)
                 + jnp.dot(h.astype(mxu_dtype), w_hh,
                           preferred_element_type=jnp.float32))   # (BT, 4*Hp) f32
        # PyTorch LSTM gate order [i, f, g, o]; Hp is a multiple of 128 so every
        # slice is a full-vreg, lane-aligned extract (no per-step XLU tax).
        i_g = jax.nn.sigmoid(gates[:, 0 * Hp:1 * Hp])
        f_g = jax.nn.sigmoid(gates[:, 1 * Hp:2 * Hp])
        g_g = jnp.tanh(gates[:, 2 * Hp:3 * Hp])
        o_g = jax.nn.sigmoid(gates[:, 3 * Hp:4 * Hp])
        c_new = f_g * c + i_g * g_g
        h_new = o_g * jnp.tanh(c_new)
        return h_new, c_new

    # Bounded unroll: LLO scheduling visibility without instruction-count /
    # live-range blowup at realistic T.
    h_last, c_last = lax.fori_loop(0, Tc, step, (h_ref[...], c_ref[...]),
                                   unroll=min(unroll, Tc))
    h_ref[...] = h_last
    c_ref[...] = c_last

    @pl.when(t_chunk == n_chunks - 1)
    def _():
        out_ref[...] = (jnp.dot(h_last.astype(mxu_dtype), w_fc_ref[...],
                                preferred_element_type=jnp.float32)
                        + b_fc_ref[...])


def _pad_gatewise(w, h, hp):
    """Zero-pad the trailing (4*h) dim gate-wise to (4*hp): each gate -> full lanes."""
    lead = w.shape[:-1]
    w4 = jnp.reshape(w, lead + (4, h))
    w4 = jnp.pad(w4, [(0, 0)] * len(lead) + [(0, 0), (0, hp - h)])
    return jnp.reshape(w4, lead + (4 * hp,))


@functools.partial(jax.jit,
                   static_argnames=("batch_tile", "max_time_chunk",
                                    "stream_dtype", "unroll"))
def news_classifier_forward(tokens, params, *, batch_tile=None,
                            max_time_chunk=32, stream_dtype=jnp.bfloat16,
                            unroll=8):
    """tokens: (B, T) int32. Returns logits (B, output_dim) float32."""
    emb = params["embedding"]                        # (V, E)
    w_ih_t = params["w_ih_t"]                        # (E, 4H)
    w_hh_t = params["w_hh_t"]                        # (H, 4H)
    b = params["b"]                                  # (1, 4H)  (b_ih + b_hh)
    w_fc_t = params["w_fc_t"]                        # (H, O)
    b_fc = params["b_fc"]                            # (1, O)

    B, T = tokens.shape
    E = emb.shape[1]
    H = w_hh_t.shape[0]
    O = w_fc_t.shape[1]

    # Lane-pad hidden / output dims (per gate) so gate slices and the final
    # store are full-vreg.
    Hp = _round_up(H, LANE)
    Gp = 4 * Hp
    Op = _round_up(O, LANE)

    # Batch tile: fill the MXU M-dimension (128 rows) at realistic batch sizes
    # without over-padding tiny batches.  v5e sweet spot is 128; pass 256 on
    # v6e/v7x.  Keep >=2 batch tiles on v7x so both TensorCores get work.
    if batch_tile is None:
        batch_tile = min(LANE, _round_up(B, SUBLANE))
    batch_tile = _round_up(batch_tile, SUBLANE)
    Bp = _round_up(max(B, batch_tile), batch_tile)

    # Balanced time chunks bounded by max_time_chunk (padding < n_chunks steps).
    n_chunks = -(-T // max_time_chunk)
    time_chunk = -(-T // n_chunks)
    Tp = n_chunks * time_chunk

    tok_p = jnp.pad(tokens, ((0, Bp - B), (0, 0)))

    # Gate-wise lane padding of parameters (zero rows/cols keep padded state inert).
    w_ih_p = _pad_gatewise(w_ih_t, H, Hp)                                # (E, Gp)
    b_p = _pad_gatewise(b, H, Hp)                                        # (1, Gp)
    w_hh_p = jnp.pad(_pad_gatewise(w_hh_t, H, Hp), ((0, Hp - H), (0, 0)))  # (Hp, Gp)
    w_fc_p = jnp.pad(w_fc_t, ((0, Hp - H), (0, Op - O)))                 # (Hp, Op)
    b_fc_p = jnp.pad(b_fc, ((0, 0), (0, Op - O)))                        # (1, Op)

    # JAX glue: TIME-MAJOR embedding gather (no HBM transpose of activations)
    # + one big input-projection matmul.  The kernel only runs the recurrence.
    x_tm = jnp.take(emb, tok_p.T, axis=0)                                # (T, Bp, E)
    xg = (jnp.dot(x_tm.reshape(T * Bp, E), w_ih_p,
                  preferred_element_type=jnp.float32)
          + b_p).reshape(T, Bp, Gp)
    # LEADING zero time-padding: with xg == 0 and (h, c) == 0 the LSTM state
    # stays exactly 0, so padded steps are semantic no-ops.
    xg = jnp.pad(xg, ((Tp - T, 0), (0, 0), (0, 0)))

    # bf16 streaming (f32 accumulation + f32 elementwise kept inside the kernel).
    xg_s = xg.astype(stream_dtype)
    w_hh_s = w_hh_p.astype(stream_dtype)
    w_fc_s = w_fc_p.astype(stream_dtype)

    kernel = functools.partial(lstm_fc_kernel, unroll=unroll)

    out = pl.pallas_call(
        kernel,
        out_shape=jax.ShapeDtypeStruct((Bp, Op), jnp.float32),
        grid=(Bp // batch_tile, n_chunks),
        in_specs=[
            # xg: a fresh time chunk per step along the "arbitrary" axis
            # (double-buffered by the pipeline -> DMA hides behind recurrence).
            pl.BlockSpec((time_chunk, batch_tile, Gp), lambda bt, tc: (tc, bt, 0)),
            # Invariant weights/bias: same block every step (fetched once).
            pl.BlockSpec((Hp, Gp), lambda bt, tc: (0, 0)),
            pl.BlockSpec((Hp, Op), lambda bt, tc: (0, 0)),
            pl.BlockSpec((1, Op), lambda bt, tc: (0, 0)),
        ],
        out_specs=pl.BlockSpec((batch_tile, Op), lambda bt, tc: (bt, 0)),
        scratch_shapes=[pltpu.VMEM((batch_tile, Hp), jnp.float32),   # h
                        pltpu.VMEM((batch_tile, Hp), jnp.float32)],  # c
        compiler_params=pltpu.CompilerParams(
            dimension_semantics=("parallel", "arbitrary")),
    )(xg_s, w_hh_s, w_fc_s, b_fc_p)

    return out[:B, :O]


def reference_forward(tokens, params):
    """Pure-JAX reference reproducing PyTorch nn.LSTM + nn.Linear semantics."""
    x = jnp.take(params["embedding"], tokens, axis=0)   # (B, T, E)
    B, T, _ = x.shape
    H = params["w_hh_t"].shape[0]
    h = jnp.zeros((B, H), jnp.float32)
    c = jnp.zeros((B, H), jnp.float32)
    for t in range(T):
        gates = x[:, t, :] @ params["w_ih_t"] + h @ params["w_hh_t"] + params["b"]
        i_g = jax.nn.sigmoid(gates[:, 0 * H:1 * H])
        f_g = jax.nn.sigmoid(gates[:, 1 * H:2 * H])
        g_g = jnp.tanh(gates[:, 2 * H:3 * H])
        o_g = jax.nn.sigmoid(gates[:, 3 * H:4 * H])
        c = f_g * c + i_g * g_g
        h = o_g * jnp.tanh(c)
    return h @ params["w_fc_t"] + params["b_fc"]


def init_params(key, vocab_size, embedding_dim, hidden_dim, output_dim):
    ks = jax.random.split(key, 7)
    s = 1.0 / np.sqrt(hidden_dim)
    return {
        "embedding": jax.random.normal(ks[0], (vocab_size, embedding_dim),
                                       jnp.float32),
        # PyTorch stores weight_ih (4H, E) / weight_hh (4H, H); we pre-transpose.
        "w_ih_t": jax.random.uniform(ks[1], (embedding_dim, 4 * hidden_dim),
                                     jnp.float32, -s, s),
        "w_hh_t": jax.random.uniform(ks[2], (hidden_dim, 4 * hidden_dim),
                                     jnp.float32, -s, s),
        # bias_ih + bias_hh folded together, kept 2D for TPU layout.
        "b": (jax.random.uniform(ks[3], (1, 4 * hidden_dim), jnp.float32, -s, s)
              + jax.random.uniform(ks[4], (1, 4 * hidden_dim), jnp.float32, -s, s)),
        "w_fc_t": jax.random.uniform(ks[5], (hidden_dim, output_dim),
                                     jnp.float32, -s, s),
        "b_fc": jax.random.uniform(ks[6], (1, output_dim), jnp.float32, -s, s),
    }


if __name__ == "__main__":
    # Small shapes consistent with the module's forward:
    # tokens (B=2, T=8), vocab=50, embedding_dim=16, hidden_dim=32, output_dim=4
    VOCAB, EMB, HID, OUT = 50, 16, 32, 4
    B, T = 2, 8

    key = jax.random.PRNGKey(0)
    k_tok, k_par = jax.random.split(key)
    params = init_params(k_par, VOCAB, EMB, HID, OUT)
    tokens = jax.random.randint(k_tok, (B, T), 0, VOCAB, dtype=jnp.int32)

    ref = jax.block_until_ready(reference_forward(tokens, params))

    # f32 streaming path: exact-semantics check.
    logits_f32 = jax.block_until_ready(
        news_classifier_forward(tokens, params, stream_dtype=jnp.float32))
    assert logits_f32.shape == (B, OUT)
    np.testing.assert_allclose(np.asarray(logits_f32), np.asarray(ref),
                               rtol=1e-2, atol=1e-2)

    # Default bf16-streaming path (f32 accumulation + f32 gate/cell math inside).
    logits_bf16 = jax.block_until_ready(news_classifier_forward(tokens, params))
    assert logits_bf16.shape == (B, OUT)
    np.testing.assert_allclose(np.asarray(logits_bf16), np.asarray(ref),
                               rtol=5e-2, atol=5e-2)

    print("KERNEL_OK")
</pallas_src>

<mosaic_0001>
module attributes {stable_mosaic.version = 11 : i64} {
  func.func @lstm_fc_kernel(%arg0: i32, %arg1: i32, %arg2: memref<8x8x512xf32, #tpu.memory_space<vmem>>, %arg3: memref<128x512xf32, #tpu.memory_space<vmem>>, %arg4: memref<128x128xf32, #tpu.memory_space<vmem>>, %arg5: memref<1x128xf32, #tpu.memory_space<vmem>>, %arg6: memref<8x128xf32, #tpu.memory_space<vmem>>, %arg7: memref<8x128xf32, #tpu.memory_space<vmem>>, %arg8: memref<8x128xf32, #tpu.memory_space<vmem>>) attributes {dimension_semantics = [#tpu.dimension_semantics<parallel>, #tpu.dimension_semantics<arbitrary>], iteration_bounds = array<i64: 1, 1>, scalar_prefetch = 0 : i64, scratch_operands = 2 : i64, tpu.core_type = #tpu.core_type<tc>, window_params = [{transform_indices = @transform_0, window_bounds = array<i64: 8, 8, 512>}, {pipeline_mode = #tpu.pipeline_mode<synchronous>, transform_indices = @transform_1, window_bounds = array<i64: 128, 512>}, {pipeline_mode = #tpu.pipeline_mode<synchronous>, transform_indices = @transform_2, window_bounds = array<i64: 128, 128>}, {pipeline_mode = #tpu.pipeline_mode<synchronous>, transform_indices = @transform_3, window_bounds = array<i64: 1, 128>}, {transform_indices = @transform_4, window_bounds = array<i64: 8, 128>}]} {
    %c0_i32 = arith.constant 0 : i32
    %0 = arith.cmpi eq, %arg1, %c0_i32 : i32
    %1 = arith.extui %0 : i1 to i32
    %c0_i32_0 = arith.constant 0 : i32
    %2 = arith.cmpi ne, %1, %c0_i32_0 : i32
    scf.if %2 {
      %cst_60 = arith.constant 0.000000e+00 : f32
      %251 = vector.broadcast %cst_60 : f32 to vector<8x128xf32>
      %c0_61 = arith.constant 0 : index
      %c0_62 = arith.constant 0 : index
      %252 = vector.load %arg7[%c0_61, %c0_62] : memref<8x128xf32, #tpu.memory_space<vmem>>, vector<8x128xf32>
      tpu.vector_store %arg7[%c0_61, %c0_62], %251 {strides = array<i32>} : memref<8x128xf32, #tpu.memory_space<vmem>>, vector<8x128xf32>,
      %cst_63 = arith.constant 0.000000e+00 : f32
      %253 = vector.broadcast %cst_63 : f32 to vector<8x128xf32>
      %c0_64 = arith.constant 0 : index
      %c0_65 = arith.constant 0 : index
      %254 = vector.load %arg8[%c0_64, %c0_65] : memref<8x128xf32, #tpu.memory_space<vmem>>, vector<8x128xf32>
      tpu.vector_store %arg8[%c0_64, %c0_65], %253 {strides = array<i32>} : memref<8x128xf32, #tpu.memory_space<vmem>>, vector<8x128xf32>,
    } else {
    }
    %c0 = arith.constant 0 : index
    %c0_1 = arith.constant 0 : index
    %3 = vector.load %arg3[%c0, %c0_1] : memref<128x512xf32, #tpu.memory_space<vmem>>, vector<128x512xf32>
    %c0_2 = arith.constant 0 : index
    %c0_3 = arith.constant 0 : index
    %4 = vector.load %arg7[%c0_2, %c0_3] : memref<8x128xf32, #tpu.memory_space<vmem>>, vector<8x128xf32>
    %c0_4 = arith.constant 0 : index
    %c0_5 = arith.constant 0 : index
    %5 = vector.load %arg8[%c0_4, %c0_5] : memref<8x128xf32, #tpu.memory_space<vmem>>, vector<8x128xf32>
    %c0_i32_6 = arith.constant 0 : i32
    %6 = arith.index_cast %c0_i32_6 : i32 to index
    %c0_7 = arith.constant 0 : index
    %c0_8 = arith.constant 0 : index
    %7 = vector.load %arg2[%6, %c0_7, %c0_8] : memref<8x8x512xf32, #tpu.memory_space<vmem>>, vector<1x8x512xf32>
    %8 = vector.shape_cast %7 : vector<1x8x512xf32> to vector<8x512xf32>
    %cst = arith.constant dense<0.000000e+00> : vector<8x512xf32>
    %9 = tpu.matmul %4, %3, %cst {dimension_numbers = #tpu.dot_dimension_numbers<[1], [0], [0], [1], [0, 0, 1, 1], [], []>} : vector<8x128xf32>, vector<128x512xf32>, vector<8x512xf32> -> vector<8x512xf32>
    %10 = arith.addf %8, %9 : vector<8x512xf32>
    %11 = vector.extract_strided_slice %10 {offsets = [0, 0], sizes = [8, 128], strides = [1, 1]} : vector<8x512xf32> to vector<8x128xf32>
    %12 = arith.negf %11 : vector<8x128xf32>
    %13 = math.exp %12 : vector<8x128xf32>
    %cst_9 = arith.constant 1.000000e+00 : f32
    %14 = vector.broadcast %cst_9 : f32 to vector<8x128xf32>
    %15 = arith.addf %14, %13 : vector<8x128xf32>
    %16 = arith.divf %14, %15 : vector<8x128xf32>
    %17 = vector.extract_strided_slice %10 {offsets = [0, 128], sizes = [8, 128], strides = [1, 1]} : vector<8x512xf32> to vector<8x128xf32>
    %18 = arith.negf %17 : vector<8x128xf32>
    %19 = math.exp %18 : vector<8x128xf32>
    %cst_10 = arith.constant 1.000000e+00 : f32
    %20 = vector.broadcast %cst_10 : f32 to vector<8x128xf32>
    %21 = arith.addf %20, %19 : vector<8x128xf32>
    %22 = arith.divf %20, %21 : vector<8x128xf32>
    %23 = vector.extract_strided_slice %10 {offsets = [0, 256], sizes = [8, 128], strides = [1, 1]} : vector<8x512xf32> to vector<8x128xf32>
    %24 = math.tanh %23 : vector<8x128xf32>
    %25 = vector.extract_strided_slice %10 {offsets = [0, 384], sizes = [8, 128], strides = [1, 1]} : vector<8x512xf32> to vector<8x128xf32>
    %26 = arith.negf %25 : vector<8x128xf32>
    %27 = math.exp %26 : vector<8x128xf32>
    %cst_11 = arith.constant 1.000000e+00 : f32
    %28 = vector.broadcast %cst_11 : f32 to vector<8x128xf32>
    %29 = arith.addf %28, %27 : vector<8x128xf32>
    %30 = arith.divf %28, %29 : vector<8x128xf32>
    %31 = arith.mulf %22, %5 : vector<8x128xf32>
    %32 = arith.mulf %16, %24 : vector<8x128xf32>
    %33 = arith.addf %31, %32 : vector<8x128xf32>
    %34 = math.tanh %33 : vector<8x128xf32>
    %35 = arith.mulf %30, %34 : vector<8x128xf32>
    %c1_i32 = arith.constant 1 : i32
    %36 = arith.index_cast %c1_i32 : i32 to index
    %c0_12 = arith.constant 0 : index
    %c0_13 = arith.constant 0 : index
    %37 = vector.load %arg2[%36, %c0_12, %c0_13] : memref<8x8x512xf32, #tpu.memory_space<vmem>>, vector<1x8x512xf32>
    %38 = vector.shape_cast %37 : vector<1x8x512xf32> to vector<8x512xf32>
    %cst_14 = arith.constant dense<0.000000e+00> : vector<8x512xf32>
    %39 = tpu.matmul %35, %3, %cst_14 {dimension_numbers = #tpu.dot_dimension_numbers<[1], [0], [0], [1], [0, 0, 1, 1], [], []>} : vector<8x128xf32>, vector<128x512xf32>, vector<8x512xf32> -> vector<8x512xf32>
    %40 = arith.addf %38, %39 : vector<8x512xf32>
    %41 = vector.extract_strided_slice %40 {offsets = [0, 0], sizes = [8, 128], strides = [1, 1]} : vector<8x512xf32> to vector<8x128xf32>
    %42 = arith.negf %41 : vector<8x128xf32>
    %43 = math.exp %42 : vector<8x128xf32>
    %cst_15 = arith.constant 1.000000e+00 : f32
    %44 = vector.broadcast %cst_15 : f32 to vector<8x128xf32>
    %45 = arith.addf %44, %43 : vector<8x128xf32>
    %46 = arith.divf %44, %45 : vector<8x128xf32>
    %47 = vector.extract_strided_slice %40 {offsets = [0, 128], sizes = [8, 128], strides = [1, 1]} : vector<8x512xf32> to vector<8x128xf32>
    %48 = arith.negf %47 : vector<8x128xf32>
    %49 = math.exp %48 : vector<8x128xf32>
    %cst_16 = arith.constant 1.000000e+00 : f32
    %50 = vector.broadcast %cst_16 : f32 to vector<8x128xf32>
    %51 = arith.addf %50, %49 : vector<8x128xf32>
    %52 = arith.divf %50, %51 : vector<8x128xf32>
    %53 = vector.extract_strided_slice %40 {offsets = [0, 256], sizes = [8, 128], strides = [1, 1]} : vector<8x512xf32> to vector<8x128xf32>
    %54 = math.tanh %53 : vector<8x128xf32>
    %55 = vector.extract_strided_slice %40 {offsets = [0, 384], sizes = [8, 128], strides = [1, 1]} : vector<8x512xf32> to vector<8x128xf32>
    %56 = arith.negf %55 : vector<8x128xf32>
    %57 = math.exp %56 : vector<8x128xf32>
    %cst_17 = arith.constant 1.000000e+00 : f32
    %58 = vector.broadcast %cst_17 : f32 to vector<8x128xf32>
    %59 = arith.addf %58, %57 : vector<8x128xf32>
    %60 = arith.divf %58, %59 : vector<8x128xf32>
    %61 = arith.mulf %52, %33 : vector<8x128xf32>
    %62 = arith.mulf %46, %54 : vector<8x128xf32>
    %63 = arith.addf %61, %62 : vector<8x128xf32>
    %64 = math.tanh %63 : vector<8x128xf32>
    %65 = arith.mulf %60, %64 : vector<8x128xf32>
    %c2_i32 = arith.constant 2 : i32
    %66 = arith.index_cast %c2_i32 : i32 to index
    %c0_18 = arith.constant 0 : index
    %c0_19 = arith.constant 0 : index
    %67 = vector.load %arg2[%66, %c0_18, %c0_19] : memref<8x8x512xf32, #tpu.memory_space<vmem>>, vector<1x8x512xf32>
    %68 = vector.shape_cast %67 : vector<1x8x512xf32> to vector<8x512xf32>
    %cst_20 = arith.constant dense<0.000000e+00> : vector<8x512xf32>
    %69 = tpu.matmul %65, %3, %cst_20 {dimension_numbers = #tpu.dot_dimension_numbers<[1], [0], [0], [1], [0, 0, 1, 1], [], []>} : vector<8x128xf32>, vector<128x512xf32>, vector<8x512xf32> -> vector<8x512xf32>
    %70 = arith.addf %68, %69 : vector<8x512xf32>
    %71 = vector.extract_strided_slice %70 {offsets = [0, 0], sizes = [8, 128], strides = [1, 1]} : vector<8x512xf32> to vector<8x128xf32>
    %72 = arith.negf %71 : vector<8x128xf32>
    %73 = math.exp %72 : vector<8x128xf32>
    %cst_21 = arith.constant 1.000000e+00 : f32
    %74 = vector.broadcast %cst_21 : f32 to vector<8x128xf32>
    %75 = arith.addf %74, %73 : vector<8x128xf32>
    %76 = arith.divf %74, %75 : vector<8x128xf32>
    %77 = vector.extract_strided_slice %70 {offsets = [0, 128], sizes = [8, 128], strides = [1, 1]} : vector<8x512xf32> to vector<8x128xf32>
    %78 = arith.negf %77 : vector<8x128xf32>
    %79 = math.exp %78 : vector<8x128xf32>
    %cst_22 = arith.constant 1.000000e+00 : f32
    %80 = vector.broadcast %cst_22 : f32 to vector<8x128xf32>
    %81 = arith.addf %80, %79 : vector<8x128xf32>
    %82 = arith.divf %80, %81 : vector<8x128xf32>
    %83 = vector.extract_strided_slice %70 {offsets = [0, 256], sizes = [8, 128], strides = [1, 1]} : vector<8x512xf32> to vector<8x128xf32>
    %84 = math.tanh %83 : vector<8x128xf32>
    %85 = vector.extract_strided_slice %70 {offsets = [0, 384], sizes = [8, 128], strides = [1, 1]} : vector<8x512xf32> to vector<8x128xf32>
    %86 = arith.negf %85 : vector<8x128xf32>
    %87 = math.exp %86 : vector<8x128xf32>
    %cst_23 = arith.constant 1.000000e+00 : f32
    %88 = vector.broadcast %cst_23 : f32 to vector<8x128xf32>
    %89 = arith.addf %88, %87 : vector<8x128xf32>
    %90 = arith.divf %88, %89 : vector<8x128xf32>
    %91 = arith.mulf %82, %63 : vector<8x128xf32>
    %92 = arith.mulf %76, %84 : vector<8x128xf32>
    %93 = arith.addf %91, %92 : vector<8x128xf32>
    %94 = math.tanh %93 : vector<8x128xf32>
    %95 = arith.mulf %90, %94 : vector<8x128xf32>
    %c3_i32 = arith.constant 3 : i32
    %96 = arith.index_cast %c3_i32 : i32 to index
    %c0_24 = arith.constant 0 : index
    %c0_25 = arith.constant 0 : index
    %97 = vector.load %arg2[%96, %c0_24, %c0_25] : memref<8x8x512xf32, #tpu.memory_space<vmem>>, vector<1x8x512xf32>
    %98 = vector.shape_cast %97 : vector<1x8x512xf32> to vector<8x512xf32>
    %cst_26 = arith.constant dense<0.000000e+00> : vector<8x512xf32>
    %99 = tpu.matmul %95, %3, %cst_26 {dimension_numbers = #tpu.dot_dimension_numbers<[1], [0], [0], [1], [0, 0, 1, 1], [], []>} : vector<8x128xf32>, vector<128x512xf32>, vector<8x512xf32> -> vector<8x512xf32>
    %100 = arith.addf %98, %99 : vector<8x512xf32>
    %101 = vector.extract_strided_slice %100 {offsets = [0, 0], sizes = [8, 128], strides = [1, 1]} : vector<8x512xf32> to vector<8x128xf32>
    %102 = arith.negf %101 : vector<8x128xf32>
    %103 = math.exp %102 : vector<8x128xf32>
    %cst_27 = arith.constant 1.000000e+00 : f32
    %104 = vector.broadcast %cst_27 : f32 to vector<8x128xf32>
    %105 = arith.addf %104, %103 : vector<8x128xf32>
    %106 = arith.divf %104, %105 : vector<8x128xf32>
    %107 = vector.extract_strided_slice %100 {offsets = [0, 128], sizes = [8, 128], strides = [1, 1]} : vector<8x512xf32> to vector<8x128xf32>
    %108 = arith.negf %107 : vector<8x128xf32>
    %109 = math.exp %108 : vector<8x128xf32>
    %cst_28 = arith.constant 1.000000e+00 : f32
    %110 = vector.broadcast %cst_28 : f32 to vector<8x128xf32>
    %111 = arith.addf %110, %109 : vector<8x128xf32>
    %112 = arith.divf %110, %111 : vector<8x128xf32>
    %113 = vector.extract_strided_slice %100 {offsets = [0, 256], sizes = [8, 128], strides = [1, 1]} : vector<8x512xf32> to vector<8x128xf32>
    %114 = math.tanh %113 : vector<8x128xf32>
    %115 = vector.extract_strided_slice %100 {offsets = [0, 384], sizes = [8, 128], strides = [1, 1]} : vector<8x512xf32> to vector<8x128xf32>
    %116 = arith.negf %115 : vector<8x128xf32>
    %117 = math.exp %116 : vector<8x128xf32>
    %cst_29 = arith.constant 1.000000e+00 : f32
    %118 = vector.broadcast %cst_29 : f32 to vector<8x128xf32>
    %119 = arith.addf %118, %117 : vector<8x128xf32>
    %120 = arith.divf %118, %119 : vector<8x128xf32>
    %121 = arith.mulf %112, %93 : vector<8x128xf32>
    %122 = arith.mulf %106, %114 : vector<8x128xf32>
    %123 = arith.addf %121, %122 : vector<8x128xf32>
    %124 = math.tanh %123 : vector<8x128xf32>
    %125 = arith.mulf %120, %124 : vector<8x128xf32>
    %c4_i32 = arith.constant 4 : i32
    %126 = arith.index_cast %c4_i32 : i32 to index
    %c0_30 = arith.constant 0 : index
    %c0_31 = arith.constant 0 : index
    %127 = vector.load %arg2[%126, %c0_30, %c0_31] : memref<8x8x512xf32, #tpu.memory_space<vmem>>, vector<1x8x512xf32>
    %128 = vector.shape_cast %127 : vector<1x8x512xf32> to vector<8x512xf32>
    %cst_32 = arith.constant dense<0.000000e+00> : vector<8x512xf32>
    %129 = tpu.matmul %125, %3, %cst_32 {dimension_numbers = #tpu.dot_dimension_numbers<[1], [0], [0], [1], [0, 0, 1, 1], [], []>} : vector<8x128xf32>, vector<128x512xf32>, vector<8x512xf32> -> vector<8x512xf32>
    %130 = arith.addf %128, %129 : vector<8x512xf32>
    %131 = vector.extract_strided_slice %130 {offsets = [0, 0], sizes = [8, 128], strides = [1, 1]} : vector<8x512xf32> to vector<8x128xf32>
    %132 = arith.negf %131 : vector<8x128xf32>
    %133 = math.exp %132 : vector<8x128xf32>
    %cst_33 = arith.constant 1.000000e+00 : f32
    %134 = vector.broadcast %cst_33 : f32 to vector<8x128xf32>
    %135 = arith.addf %134, %133 : vector<8x128xf32>
    %136 = arith.divf %134, %135 : vector<8x128xf32>
    %137 = vector.extract_strided_slice %130 {offsets = [0, 128], sizes = [8, 128], strides = [1, 1]} : vector<8x512xf32> to vector<8x128xf32>
    %138 = arith.negf %137 : vector<8x128xf32>
    %139 = math.exp %138 : vector<8x128xf32>
    %cst_34 = arith.constant 1.000000e+00 : f32
    %140 = vector.broadcast %cst_34 : f32 to vector<8x128xf32>
    %141 = arith.addf %140, %139 : vector<8x128xf32>
    %142 = arith.divf %140, %141 : vector<8x128xf32>
    %143 = vector.extract_strided_slice %130 {offsets = [0, 256], sizes = [8, 128], strides = [1, 1]} : vector<8x512xf32> to vector<8x128xf32>
    %144 = math.tanh %143 : vector<8x128xf32>
    %145 = vector.extract_strided_slice %130 {offsets = [0, 384], sizes = [8, 128], strides = [1, 1]} : vector<8x512xf32> to vector<8x128xf32>
    %146 = arith.negf %145 : vector<8x128xf32>
    %147 = math.exp %146 : vector<8x128xf32>
    %cst_35 = arith.constant 1.000000e+00 : f32
    %148 = vector.broadcast %cst_35 : f32 to vector<8x128xf32>
    %149 = arith.addf %148, %147 : vector<8x128xf32>
    %150 = arith.divf %148, %149 : vector<8x128xf32>
    %151 = arith.mulf %142, %123 : vector<8x128xf32>
    %152 = arith.mulf %136, %144 : vector<8x128xf32>
    %153 = arith.addf %151, %152 : vector<8x128xf32>
    %154 = math.tanh %153 : vector<8x128xf32>
    %155 = arith.mulf %150, %154 : vector<8x128xf32>
    %c5_i32 = arith.constant 5 : i32
    %156 = arith.index_cast %c5_i32 : i32 to index
    %c0_36 = arith.constant 0 : index
    %c0_37 = arith.constant 0 : index
    %157 = vector.load %arg2[%156, %c0_36, %c0_37] : memref<8x8x512xf32, #tpu.memory_space<vmem>>, vector<1x8x512xf32>
    %158 = vector.shape_cast %157 : vector<1x8x512xf32> to vector<8x512xf32>
    %cst_38 = arith.constant dense<0.000000e+00> : vector<8x512xf32>
    %159 = tpu.matmul %155, %3, %cst_38 {dimension_numbers = #tpu.dot_dimension_numbers<[1], [0], [0], [1], [0, 0, 1, 1], [], []>} : vector<8x128xf32>, vector<128x512xf32>, vector<8x512xf32> -> vector<8x512xf32>
    %160 = arith.addf %158, %159 : vector<8x512xf32>
    %161 = vector.extract_strided_slice %160 {offsets = [0, 0], sizes = [8, 128], strides = [1, 1]} : vector<8x512xf32> to vector<8x128xf32>
    %162 = arith.negf %161 : vector<8x128xf32>
    %163 = math.exp %162 : vector<8x128xf32>
    %cst_39 = arith.constant 1.000000e+00 : f32
    %164 = vector.broadcast %cst_39 : f32 to vector<8x128xf32>
    %165 = arith.addf %164, %163 : vector<8x128xf32>
    %166 = arith.divf %164, %165 : vector<8x128xf32>
    %167 = vector.extract_strided_slice %160 {offsets = [0, 128], sizes = [8, 128], strides = [1, 1]} : vector<8x512xf32> to vector<8x128xf32>
    %168 = arith.negf %167 : vector<8x128xf32>
    %169 = math.exp %168 : vector<8x128xf32>
    %cst_40 = arith.constant 1.000000e+00 : f32
    %170 = vector.broadcast %cst_40 : f32 to vector<8x128xf32>
    %171 = arith.addf %170, %169 : vector<8x128xf32>
    %172 = arith.divf %170, %171 : vector<8x128xf32>
    %173 = vector.extract_strided_slice %160 {offsets = [0, 256], sizes = [8, 128], strides = [1, 1]} : vector<8x512xf32> to vector<8x128xf32>
    %174 = math.tanh %173 : vector<8x128xf32>
    %175 = vector.extract_strided_slice %160 {offsets = [0, 384], sizes = [8, 128], strides = [1, 1]} : vector<8x512xf32> to vector<8x128xf32>
    %176 = arith.negf %175 : vector<8x128xf32>
    %177 = math.exp %176 : vector<8x128xf32>
    %cst_41 = arith.constant 1.000000e+00 : f32
    %178 = vector.broadcast %cst_41 : f32 to vector<8x128xf32>
    %179 = arith.addf %178, %177 : vector<8x128xf32>
    %180 = arith.divf %178, %179 : vector<8x128xf32>
    %181 = arith.mulf %172, %153 : vector<8x128xf32>
    %182 = arith.mulf %166, %174 : vector<8x128xf32>
    %183 = arith.addf %181, %182 : vector<8x128xf32>
    %184 = math.tanh %183 : vector<8x128xf32>
    %185 = arith.mulf %180, %184 : vector<8x128xf32>
    %c6_i32 = arith.constant 6 : i32
    %186 = arith.index_cast %c6_i32 : i32 to index
    %c0_42 = arith.constant 0 : index
    %c0_43 = arith.constant 0 : index
    %187 = vector.load %arg2[%186, %c0_42, %c0_43] : memref<8x8x512xf32, #tpu.memory_space<vmem>>, vector<1x8x512xf32>
    %188 = vector.shape_cast %187 : vector<1x8x512xf32> to vector<8x512xf32>
    %cst_44 = arith.constant dense<0.000000e+00> : vector<8x512xf32>
    %189 = tpu.matmul %185, %3, %cst_44 {dimension_numbers = #tpu.dot_dimension_numbers<[1], [0], [0], [1], [0, 0, 1, 1], [], []>} : vector<8x128xf32>, vector<128x512xf32>, vector<8x512xf32> -> vector<8x512xf32>
    %190 = arith.addf %188, %189 : vector<8x512xf32>
    %191 = vector.extract_strided_slice %190 {offsets = [0, 0], sizes = [8, 128], strides = [1, 1]} : vector<8x512xf32> to vector<8x128xf32>
    %192 = arith.negf %191 : vector<8x128xf32>
    %193 = math.exp %192 : vector<8x128xf32>
    %cst_45 = arith.constant 1.000000e+00 : f32
    %194 = vector.broadcast %cst_45 : f32 to vector<8x128xf32>
    %195 = arith.addf %194, %193 : vector<8x128xf32>
    %196 = arith.divf %194, %195 : vector<8x128xf32>
    %197 = vector.extract_strided_slice %190 {offsets = [0, 128], sizes = [8, 128], strides = [1, 1]} : vector<8x512xf32> to vector<8x128xf32>
    %198 = arith.negf %197 : vector<8x128xf32>
    %199 = math.exp %198 : vector<8x128xf32>
    %cst_46 = arith.constant 1.000000e+00 : f32
    %200 = vector.broadcast %cst_46 : f32 to vector<8x128xf32>
    %201 = arith.addf %200, %199 : vector<8x128xf32>
    %202 = arith.divf %200, %201 : vector<8x128xf32>
    %203 = vector.extract_strided_slice %190 {offsets = [0, 256], sizes = [8, 128], strides = [1, 1]} : vector<8x512xf32> to vector<8x128xf32>
    %204 = math.tanh %203 : vector<8x128xf32>
    %205 = vector.extract_strided_slice %190 {offsets = [0, 384], sizes = [8, 128], strides = [1, 1]} : vector<8x512xf32> to vector<8x128xf32>
    %206 = arith.negf %205 : vector<8x128xf32>
    %207 = math.exp %206 : vector<8x128xf32>
    %cst_47 = arith.constant 1.000000e+00 : f32
    %208 = vector.broadcast %cst_47 : f32 to vector<8x128xf32>
    %209 = arith.addf %208, %207 : vector<8x128xf32>
    %210 = arith.divf %208, %209 : vector<8x128xf32>
    %211 = arith.mulf %202, %183 : vector<8x128xf32>
    %212 = arith.mulf %196, %204 : vector<8x128xf32>
    %213 = arith.addf %211, %212 : vector<8x128xf32>
    %214 = math.tanh %213 : vector<8x128xf32>
    %215 = arith.mulf %210, %214 : vector<8x128xf32>
    %c7_i32 = arith.constant 7 : i32
    %216 = arith.index_cast %c7_i32 : i32 to index
    %c0_48 = arith.constant 0 : index
    %c0_49 = arith.constant 0 : index
    %217 = vector.load %arg2[%216, %c0_48, %c0_49] : memref<8x8x512xf32, #tpu.memory_space<vmem>>, vector<1x8x512xf32>
    %218 = vector.shape_cast %217 : vector<1x8x512xf32> to vector<8x512xf32>
    %cst_50 = arith.constant dense<0.000000e+00> : vector<8x512xf32>
    %219 = tpu.matmul %215, %3, %cst_50 {dimension_numbers = #tpu.dot_dimension_numbers<[1], [0], [0], [1], [0, 0, 1, 1], [], []>} : vector<8x128xf32>, vector<128x512xf32>, vector<8x512xf32> -> vector<8x512xf32>
    %220 = arith.addf %218, %219 : vector<8x512xf32>
    %221 = vector.extract_strided_slice %220 {offsets = [0, 0], sizes = [8, 128], strides = [1, 1]} : vector<8x512xf32> to vector<8x128xf32>
    %222 = arith.negf %221 : vector<8x128xf32>
    %223 = math.exp %222 : vector<8x128xf32>
    %cst_51 = arith.constant 1.000000e+00 : f32
    %224 = vector.broadcast %cst_51 : f32 to vector<8x128xf32>
    %225 = arith.addf %224, %223 : vector<8x128xf32>
    %226 = arith.divf %224, %225 : vector<8x128xf32>
    %227 = vector.extract_strided_slice %220 {offsets = [0, 128], sizes = [8, 128], strides = [1, 1]} : vector<8x512xf32> to vector<8x128xf32>
    %228 = arith.negf %227 : vector<8x128xf32>
    %229 = math.exp %228 : vector<8x128xf32>
    %cst_52 = arith.constant 1.000000e+00 : f32
    %230 = vector.broadcast %cst_52 : f32 to vector<8x128xf32>
    %231 = arith.addf %230, %229 : vector<8x128xf32>
    %232 = arith.divf %230, %231 : vector<8x128xf32>
    %233 = vector.extract_strided_slice %220 {offsets = [0, 256], sizes = [8, 128], strides = [1, 1]} : vector<8x512xf32> to vector<8x128xf32>
    %234 = math.tanh %233 : vector<8x128xf32>
    %235 = vector.extract_strided_slice %220 {offsets = [0, 384], sizes = [8, 128], strides = [1, 1]} : vector<8x512xf32> to vector<8x128xf32>
    %236 = arith.negf %235 : vector<8x128xf32>
    %237 = math.exp %236 : vector<8x128xf32>
    %cst_53 = arith.constant 1.000000e+00 : f32
    %238 = vector.broadcast %cst_53 : f32 to vector<8x128xf32>
    %239 = arith.addf %238, %237 : vector<8x128xf32>
    %240 = arith.divf %238, %239 : vector<8x128xf32>
    %241 = arith.mulf %232, %213 : vector<8x128xf32>
    %242 = arith.mulf %226, %234 : vector<8x128xf32>
    %243 = arith.addf %241, %242 : vector<8x128xf32>
    %244 = math.tanh %243 : vector<8x128xf32>
    %245 = arith.mulf %240, %244 : vector<8x128xf32>
    %c8_i32 = arith.constant 8 : i32
    %c0_54 = arith.constant 0 : index
    %c0_55 = arith.constant 0 : index
    %246 = vector.load %arg7[%c0_54, %c0_55] : memref<8x128xf32, #tpu.memory_space<vmem>>, vector<8x128xf32>
    tpu.vector_store %arg7[%c0_54, %c0_55], %245 {strides = array<i32>} : memref<8x128xf32, #tpu.memory_space<vmem>>, vector<8x128xf32>,
    %c0_56 = arith.constant 0 : index
    %c0_57 = arith.constant 0 : index
    %247 = vector.load %arg8[%c0_56, %c0_57] : memref<8x128xf32, #tpu.memory_space<vmem>>, vector<8x128xf32>
    tpu.vector_store %arg8[%c0_56, %c0_57], %243 {strides = array<i32>} : memref<8x128xf32, #tpu.memory_space<vmem>>, vector<8x128xf32>,
    %c0_i32_58 = arith.constant 0 : i32
    %248 = arith.cmpi eq, %arg1, %c0_i32_58 : i32
    %249 = arith.extui %248 : i1 to i32
    %c0_i32_59 = arith.constant 0 : i32
    %250 = arith.cmpi ne, %249, %c0_i32_59 : i32
    scf.if %250 {
      %c0_60 = arith.constant 0 : index
      %c0_61 = arith.constant 0 : index
      %251 = vector.load %arg4[%c0_60, %c0_61] : memref<128x128xf32, #tpu.memory_space<vmem>>, vector<128x128xf32>
      %cst_62 = arith.constant dense<0.000000e+00> : vector<8x128xf32>
      %252 = tpu.matmul %245, %251, %cst_62 {dimension_numbers = #tpu.dot_dimension_numbers<[1], [0], [0], [1], [0, 0, 1, 1], [], []>} : vector<8x128xf32>, vector<128x128xf32>, vector<8x128xf32> -> vector<8x128xf32>
      %c0_63 = arith.constant 0 : index
      %c0_64 = arith.constant 0 : index
      %253 = vector.load %arg5[%c0_63, %c0_64] : memref<1x128xf32, #tpu.memory_space<vmem>>, vector<1x128xf32>
      %254 = vector.broadcast %253 : vector<1x128xf32> to vector<8x128xf32>
      %255 = arith.addf %252, %254 : vector<8x128xf32>
      %c0_65 = arith.constant 0 : index
      %c0_66 = arith.constant 0 : index
      %256 = vector.load %arg6[%c0_65, %c0_66] : memref<8x128xf32, #tpu.memory_space<vmem>>, vector<8x128xf32>
      tpu.vector_store %arg6[%c0_65, %c0_66], %255 {strides = array<i32>} : memref<8x128xf32, #tpu.memory_space<vmem>>, vector<8x128xf32>,
    } else {
    }
    return
  }
  func.func @transform_0(%arg0: i32, %arg1: i32) -> (i32, i32, i32) {
    %c0_i32 = arith.constant 0 : i32
    %c0_i32_0 = arith.constant 0 : i32
    return %arg1, %arg0, %c0_i32 : i32, i32, i32
  }
  func.func @transform_1(%arg0: i32, %arg1: i32) -> (i32, i32) {
    %c0_i32 = arith.constant 0 : i32
    %c0_i32_0 = arith.constant 0 : i32
    %c0_i32_1 = arith.constant 0 : i32
    return %c0_i32, %c0_i32_0 : i32, i32
  }
  func.func @transform_2(%arg0: i32, %arg1: i32) -> (i32, i32) {
    %c0_i32 = arith.constant 0 : i32
    %c0_i32_0 = arith.constant 0 : i32
    %c0_i32_1 = arith.constant 0 : i32
    return %c0_i32, %c0_i32_0 : i32, i32
  }
  func.func @transform_3(%arg0: i32, %arg1: i32) -> (i32, i32) {
    %c0_i32 = arith.constant 0 : i32
    %c0_i32_0 = arith.constant 0 : i32
    %c0_i32_1 = arith.constant 0 : i32
    return %c0_i32, %c0_i32_0 : i32, i32
  }
  func.func @transform_4(%arg0: i32, %arg1: i32) -> (i32, i32) {
    %c0_i32 = arith.constant 0 : i32
    %c0_i32_0 = arith.constant 0 : i32
    return %arg0, %c0_i32 : i32, i32
  }
}

</mosaic_0001>

<bundles_post_ra>
// kernel: news_classifier_forward.1
= control target key start
LH: loop header
LB: loop body
LE: loop exit
PB: predicated region body
PF: predicated region fallthrough
CT: control target
= control target key end

     0   :  { %v2363_v3 = vmov 0.0   ;;  %vm2365_vm0 = vmmov 0   ;;  %s3100_s1 = inlined_call_operand.vmem [shape: f32[128,512], index: 1, kind: input, shape index: {}]   ;;  %s3101_s0 = inlined_call_operand.vmem [shape: f32[8,8,512], index: 0, kind: input, shape index: {}]   ;;  %s3102_s2 = inlined_call_operand.vmem [shape: f32[128,128], index: 2, kind: input, shape index: {}]   ;;  %s3103_s3 = inlined_call_operand.vmem [shape: f32[1,128], index: 3, kind: input, shape index: {}]   ;;  %s3104_s4 = inlined_call_operand.vmem [shape: f32[8,128], index: 4, kind: output, shape index: {}]  }
   0x1   :  { %v24_v0 = vld [vmem:[%s3100_s1 + $0x8] sm:$0xff]  ;;  %v23_v2 = vld [vmem:[%s3100_s1] sm:$0xff]  ;;  %157 = vmatprep.mubr.f32.mxu0 %v2363_v3  ;;  %228 = vmatprep.mubr.f32.mxu1 %v2363_v3  ;;  %v26_v19 = vld [vmem:[%s3100_s1 + $0x18] sm:$0xff] }
   0x2   :  { %v28_v1 = vld [vmem:[%s3100_s1 + $0x28] sm:$0xff]  ;;  %v27_v5 = vld [vmem:[%s3100_s1 + $0x20] sm:$0xff]  ;;  %v30_v20 = vld [vmem:[%s3100_s1 + $0x38] sm:$0xff] }
   0x3   :  { %v2402_v4 = vpack.c.bf16 %v28_v1, %v24_v0  ;;  %v32_v6 = vld [vmem:[%s3100_s1 + $0x48] sm:$0xff]  ;;  %v2413_v8 = vpack.c.bf16 %v27_v5, %v23_v2  ;;  %v31_v10 = vld [vmem:[%s3100_s1 + $0x40] sm:$0xff]  ;;  %v2454_v22 = vpack.c.bf16 %v30_v20, %v26_v19  ;;  %v25_v23 = vld [vmem:[%s3100_s1 + $0x10] sm:$0xff] }
   0x4   :  { %v36_v7 = vld [vmem:[%s3100_s1 + $0x68] sm:$0xff]  ;;  %v35_v11 = vld [vmem:[%s3100_s1 + $0x60] sm:$0xff]  ;;  %v29_v24 = vld [vmem:[%s3100_s1 + $0x30] sm:$0xff] }
   0x5   :  { %v2415_v9 = vpack.c.bf16 %v36_v7, %v32_v6  ;;  %v40_v12 = vld [vmem:[%s3100_s1 + $0x88] sm:$0xff]  ;;  %1697 = vmatprep.subr.bf16.mxu0 %v2402_v4  ;;  %v2431_v14 = vpack.c.bf16 %v35_v11, %v31_v10  ;;  %v39_v15 = vld [vmem:[%s3100_s1 + $0x80] sm:$0xff]  ;;  %v2462_v25 = vpack.c.bf16 %v29_v24, %v25_v23  ;;  %1729 = vmatprep.subr.bf16.mxu1 %v2454_v22  ;;  %v34_v27 = vld [vmem:[%s3100_s1 + $0x58] sm:$0xff] }
   0x6   :  { %v44_v13 = vld [vmem:[%s3100_s1 + $0xa8] sm:$0xff]  ;;  %1699 = vmatpush1.bf16.msra.mxu0 %v2413_v8  ;;  %v43_v16 = vld [vmem:[%s3100_s1 + $0xa0] sm:$0xff]  ;;  %v38_v28 = vld [vmem:[%s3100_s1 + $0x78] sm:$0xff] }
   0x7   :  { %1701 = vmatprep.subr.bf16.mxu0 %v2415_v9  ;;  %v2440_v17 = vpack.c.bf16 %v44_v13, %v40_v12  ;;  %v48_v18 = vld [vmem:[%s3100_s1 + $0xc8] sm:$0xff]  ;;  %v2465_v26 = vpack.c.bf16 %v43_v16, %v39_v15  ;;  %v33_v29 = vld [vmem:[%s3100_s1 + $0x50] sm:$0xff]  ;;  %v47_v31 = vld [vmem:[%s3100_s1 + $0xc0] sm:$0xff]  ;;  %1731 = vmatpush1.bf16.msra.mxu1 %v2462_v25  ;;  %v2487_v33 = vpack.c.bf16 %v38_v28, %v34_v27 }
   0x8   :  { %v52_v21 = vld [vmem:[%s3100_s1 + $0xe8] sm:$0xff]  ;;  %v51_v32 = vld [vmem:[%s3100_s1 + $0xe0] sm:$0xff]  ;;  %v37_v34 = vld [vmem:[%s3100_s1 + $0x70] sm:$0xff] }
   0x9   :  { %v2478_v30 = vpack.c.bf16 %v52_v21, %v48_v18  ;;  %v56_v35 = vld [vmem:[%s3100_s1 + $0x108] sm:$0xff]  ;;  %v2498_v37 = vpack.c.bf16 %v37_v34, %v33_v29  ;;  %v42_v38 = vld [vmem:[%s3100_s1 + $0x98] sm:$0xff]  ;;  %1733 = vmatprep.subr.bf16.mxu1 %v2487_v33  ;;  %v41_v40 = vld [vmem:[%s3100_s1 + $0x90] sm:$0xff]  ;;  %v2514_v42 = vpack.c.bf16 %v51_v32, %v47_v31 }
   0xa   :  { %1703 = vmatpush1.bf16.msra.mxu0 %v2431_v14  ;;  %v60_v36 = vld [vmem:[%s3100_s1 + $0x128] sm:$0xff]  ;;  %v46_v39 = vld [vmem:[%s3100_s1 + $0xb8] sm:$0xff]  ;;  %v45_v41 = vld [vmem:[%s3100_s1 + $0xb0] sm:$0xff] }
   0xb   :  { %1705 = vmatprep.subr.bf16.mxu0 %v2440_v17  ;;  %v55_v43 = vld [vmem:[%s3100_s1 + $0x100] sm:$0xff]  ;;  %v2522_v45 = vpack.c.bf16 %v46_v39, %v42_v38  ;;  %v2525_v46 = vpack.c.bf16 %v60_v36, %v56_v35  ;;  %1735 = vmatpush1.bf16.msra.mxu1 %v2498_v37  ;;  %v64_v47 = vld [vmem:[%s3100_s1 + $0x148] sm:$0xff]  ;;  %v2531_v48 = vpack.c.bf16 %v45_v41, %v41_v40  ;;  %v50_v49 = vld [vmem:[%s3100_s1 + $0xd8] sm:$0xff] }
   0xc   :  { %v59_v44 = vld [vmem:[%s3100_s1 + $0x120] sm:$0xff]  ;;  %v54_v50 = vld [vmem:[%s3100_s1 + $0xf8] sm:$0xff]  ;;  %v68_v51 = vld [vmem:[%s3100_s1 + $0x168] sm:$0xff] }
   0xd   :  { %1737 = vmatprep.subr.bf16.mxu1 %v2522_v45  ;;  %v2543_v52 = vpack.c.bf16 %v54_v50, %v50_v49  ;;  %v49_v53 = vld [vmem:[%s3100_s1 + $0xd0] sm:$0xff]  ;;  %v2552_v55 = vpack.c.bf16 %v59_v44, %v55_v43  ;;  %v58_v56 = vld [vmem:[%s3100_s1 + $0x118] sm:$0xff]  ;;  %v2561_v58 = vpack.c.bf16 %v68_v51, %v64_v47  ;;  %v63_v59 = vld [vmem:[%s3100_s1 + $0x140] sm:$0xff] }
   0xe   :  { %1707 = vmatpush1.bf16.msra.mxu0 %v2465_v26  ;;  %v53_v54 = vld [vmem:[%s3100_s1 + $0xf0] sm:$0xff]  ;;  %v62_v57 = vld [vmem:[%s3100_s1 + $0x138] sm:$0xff]  ;;  %v67_v60 = vld [vmem:[%s3100_s1 + $0x160] sm:$0xff] }
   0xf   :  { %1709 = vmatprep.subr.bf16.mxu0 %v2478_v30  ;;  %1739 = vmatpush1.bf16.msra.mxu1 %v2531_v48  ;;  %v72_v61 = vld [vmem:[%s3100_s1 + $0x188] sm:$0xff]  ;;  %v2573_v62 = vpack.c.bf16 %v53_v54, %v49_v53  ;;  %v2579_v0 = vpack.c.bf16 %v62_v57, %v58_v56  ;;  %v57_v1 = vld [vmem:[%s3100_s1 + $0x110] sm:$0xff]  ;;  %v66_v5 = vld [vmem:[%s3100_s1 + $0x158] sm:$0xff]  ;;  %v2594_v7 = vpack.c.bf16 %v67_v60, %v63_v59 }
  0x10   :  { %v76_v63 = vld [vmem:[%s3100_s1 + $0x1a8] sm:$0xff]  ;;  %1741 = vmatprep.subr.bf16.mxu1 %v2543_v52  ;;  %v61_v2 = vld [vmem:[%s3100_s1 + $0x130] sm:$0xff]  ;;  %v70_v6 = vld [vmem:[%s3100_s1 + $0x178] sm:$0xff] }
  0x11   :  { %v2597_v10 = vpack.c.bf16 %v76_v63, %v72_v61  ;;  %v71_v11 = vld [vmem:[%s3100_s1 + $0x180] sm:$0xff]  ;;  %v80_v13 = vld [vmem:[%s3100_s1 + $0x1c8] sm:$0xff]  ;;  %v2609_v15 = vpack.c.bf16 %v61_v2, %v57_v1  ;;  %v2615_v18 = vpack.c.bf16 %v70_v6, %v66_v5  ;;  %v65_v19 = vld [vmem:[%s3100_s1 + $0x150] sm:$0xff] }
  0x12   :  { %1711 = vmatpush1.bf16.msra.mxu0 %v2514_v42  ;;  %v75_v12 = vld [vmem:[%s3100_s1 + $0x1a0] sm:$0xff]  ;;  %v84_v16 = vld [vmem:[%s3100_s1 + $0x1e8] sm:$0xff]  ;;  %v69_v20 = vld [vmem:[%s3100_s1 + $0x170] sm:$0xff] }
  0x13   :  { %1713 = vmatprep.subr.bf16.mxu0 %v2525_v46  ;;  %1743 = vmatpush1.bf16.msra.mxu1 %v2573_v62  ;;  %v74_v21 = vld [vmem:[%s3100_s1 + $0x198] sm:$0xff]  ;;  %v2630_v24 = vpack.c.bf16 %v75_v12, %v71_v11  ;;  %v2633_v27 = vpack.c.bf16 %v84_v16, %v80_v13  ;;  %v79_v28 = vld [vmem:[%s3100_s1 + $0x1c0] sm:$0xff]  ;;  %v2642_v31 = vpack.c.bf16 %v69_v20, %v65_v19  ;;  %v73_v34 = vld [vmem:[%s3100_s1 + $0x190] sm:$0xff] }
  0x14   :  { %1745 = vmatprep.subr.bf16.mxu1 %v2579_v0  ;;  %v78_v23 = vld [vmem:[%s3100_s1 + $0x1b8] sm:$0xff]  ;;  %v83_v29 = vld [vmem:[%s3100_s1 + $0x1e0] sm:$0xff]  ;;  %v77_v35 = vld [vmem:[%s3100_s1 + $0x1b0] sm:$0xff] }
  0x15   :  { %v2645_v32 = vpack.c.bf16 %v78_v23, %v74_v21  ;;  %v82_v36 = vld [vmem:[%s3100_s1 + $0x1d8] sm:$0xff]  ;;  %v2660_v39 = vpack.c.bf16 %v83_v29, %v79_v28  ;;  %v2664_v40 = vpack.c.bf16 %v77_v35, %v73_v34  ;;  %v81_v43 = vld [vmem:[%s3100_s1 + $0x1d0] sm:$0xff]  ;;  %v89_v49 = vld [vmem:[%s3101_s0] sm:$0xff] }
  0x16   :  { %1715 = vmatpush1.bf16.msra.mxu0 %v2552_v55  ;;  %v86_v38 = vld [vmem:[%s3100_s1 + $0x1f8] sm:$0xff]  ;;  %v85_v44 = vld [vmem:[%s3100_s1 + $0x1f0] sm:$0xff]  ;;  %v90_v50 = vld [vmem:[%s3101_s0 + $0x8] sm:$0xff] }
  0x17   :  { %1717 = vmatprep.subr.bf16.mxu0 %v2561_v58  ;;  %1747 = vmatpush1.bf16.msra.mxu1 %v2609_v15  ;;  %v2667_v41 = vpack.c.bf16 %v86_v38, %v82_v36  ;;  %v2677_v47 = vpack.c.bf16 %v85_v44, %v81_v43  ;;  %v92_v60 = vld [vmem:[%s3101_s0 + $0x18] sm:$0xff]  ;;  %v91_v2 = vld [vmem:[%s3101_s0 + $0x10] sm:$0xff]  ;;  %v1594_v44 = vld [vmem:[%s3101_s0 + $0x20] sm:$0xff] }
  0x18   :  { %1749 = vmatprep.subr.bf16.mxu1 %v2615_v18 }
  0x1a   :  { %1719 = vmatpush1.bf16.msra.mxu0 %v2594_v7 }
  0x1b   :  { %1721 = vmatprep.subr.bf16.mxu0 %v2597_v10  ;;  %1751 = vmatpush1.bf16.msra.mxu1 %v2642_v31 }
  0x1c   :  { %1753 = vmatprep.subr.bf16.mxu1 %v2645_v32 }
  0x1e   :  { %1723 = vmatpush1.bf16.msra.mxu0 %v2630_v24 }
  0x1f   :  { %1725 = vmatprep.subr.bf16.mxu0 %v2633_v27  ;;  %1755 = vmatpush1.bf16.msra.mxu1 %v2664_v40 }
  0x20   :  { %1757 = vmatprep.subr.bf16.mxu1 %v2667_v41 }
  0x22   :  { %1727 = vmatpush1.bf16.msra.mxu0 %v2660_v39 }
  0x23   :  { %1761 = vmatprep.subr.bf16.mxu0 %v2402_v4  ;;  %1759 = vmatpush1.bf16.msra.mxu1 %v2677_v47 }
  0x24   :  { %1793 = vmatprep.subr.bf16.mxu1 %v2454_v22 }
  0x25   :  { %158 = vmatmul.mubr.f32.vlgmr.msra.gmra.mrb[0].mxu0 %v2363_v3 }
  0x26   :  { %1763 = vmatpush1.bf16.msra.mxu0 %v2413_v8  ;;  %332 = vmatprep.mubr.f32.mxu0 %v2363_v3 }
  0x27   :  { %1765 = vmatprep.subr.bf16.mxu0 %v2415_v9  ;;  %229 = vmatmul.mubr.f32.vlgmr.msra.gmra.mrb[0].mxu1 %v2363_v3 }
  0x28   :  { %1795 = vmatpush1.bf16.msra.mxu1 %v2462_v25  ;;  %403 = vmatprep.mubr.f32.mxu1 %v2363_v3 }
  0x29   :  { %1797 = vmatprep.subr.bf16.mxu1 %v2487_v33 }
  0x2a   :  { %1767 = vmatpush1.bf16.msra.mxu0 %v2431_v14 }
  0x2b   :  { %1769 = vmatprep.subr.bf16.mxu0 %v2440_v17 }
  0x2c   :  { %1799 = vmatpush1.bf16.msra.mxu1 %v2498_v37 }
  0x2d   :  { %1801 = vmatprep.subr.bf16.mxu1 %v2522_v45 }
  0x2e   :  { %1771 = vmatpush1.bf16.msra.mxu0 %v2465_v26 }
  0x2f   :  { %1773 = vmatprep.subr.bf16.mxu0 %v2478_v30 }
  0x30   :  { %1803 = vmatpush1.bf16.msra.mxu1 %v2531_v48 }
  0x31   :  { %1805 = vmatprep.subr.bf16.mxu1 %v2543_v52 }
  0x32   :  { %1775 = vmatpush1.bf16.msra.mxu0 %v2514_v42 }
  0x33   :  { %1777 = vmatprep.subr.bf16.mxu0 %v2525_v46 }
  0x34   :  { %1807 = vmatpush1.bf16.msra.mxu1 %v2573_v62 }
  0x35   :  { %1809 = vmatprep.subr.bf16.mxu1 %v2579_v0 }
  0x36   :  { %1779 = vmatpush1.bf16.msra.mxu0 %v2552_v55 }
  0x37   :  { %1781 = vmatprep.subr.bf16.mxu0 %v2561_v58 }
  0x38   :  { %1811 = vmatpush1.bf16.msra.mxu1 %v2609_v15 }
  0x39   :  { %1813 = vmatprep.subr.bf16.mxu1 %v2615_v18 }
  0x3a   :  { %1783 = vmatpush1.bf16.msra.mxu0 %v2594_v7 }
  0x3b   :  { %1785 = vmatprep.subr.bf16.mxu0 %v2597_v10 }
  0x3c   :  { %1815 = vmatpush1.bf16.msra.mxu1 %v2642_v31 }
  0x3d   :  { %1817 = vmatprep.subr.bf16.mxu1 %v2645_v32 }
  0x3e   :  { %1787 = vmatpush1.bf16.msra.mxu0 %v2630_v24 }
  0x3f   :  { %1789 = vmatprep.subr.bf16.mxu0 %v2633_v27 }
  0x40   :  { %1819 = vmatpush1.bf16.msra.mxu1 %v2664_v40 }
  0x41   :  { %1821 = vmatprep.subr.bf16.mxu1 %v2667_v41 }
  0x42   :  { %1791 = vmatpush1.bf16.msra.mxu0 %v2660_v39 }
  0x43   :  { %1825 = vmatprep.subr.bf16.mxu0 %v2402_v4 }
  0x44   :  { %1823 = vmatpush1.bf16.msra.mxu1 %v2677_v47 }
  0x45   :  { %1857 = vmatprep.subr.bf16.mxu1 %v2454_v22 }
  0xf8   :  { %v159_v51 = vpop.f32.mrb[0].mxu0 }
  0xf9   :  { %v235_v53 = vadd.f32 %v159_v51, %v89_v49  ;;  %v161_v54 = vpop.f32.mrb[1].mxu0  ;;  %v1595_v49 = vld [vmem:[%s3101_s0 + $0x28] sm:$0xff] }
  0xfa   :  { %v236_v56 = vadd.f32 %v161_v54, %v90_v50  ;;  %v230_v61 = vpop.f32.mrb[0].mxu1 }
  0xfb   :  { %v1591_v57 = vmul.f32 -1.442695, %v235_v53  ;;  %v232_v63 = vpop.f32.mrb[1].mxu1  ;;  %v237_v6 = vadd.f32 %v230_v61, %v91_v2  ;;  %v1597_v61 = vld [vmem:[%s3101_s0 + $0x38] sm:$0xff] }
  0xfc   :  { %v1592_v59 = vmul.f32 -1.442695, %v236_v56  ;;  %v238_v1 = vadd.f32 %v232_v63, %v92_v60 }
  0xfd   :  { %2235 = vpow2.f32 %v1591_v57 }
  0xfe   :  { %2237 = vpow2.f32 %v1592_v59  ;;  %v1593_v5 = vmul.f32 -1.442695, %v238_v1  ;;  %v1596_v1 = vld [vmem:[%s3101_s0 + $0x30] sm:$0xff] }
 0x100   :  { %2239 = vpow2.f32 %v1593_v5 }
 0x101   :  { %2241 = vtanh.f32 %v237_v6 }
 0x107   :  { %v2236_v11 = vpop.eup %2235 }
 0x108   :  { %v2238_v12 = vpop.eup %2237  ;;  %v242_v13 = vadd.f32 1.0, %v2236_v11 }
 0x109   :  { %v248_v16 = vadd.f32 1.0, %v2238_v12 }
 0x10a   :  { %2243 = vrcp.f32 %v242_v13  ;;  %v2240_v19 = vpop.eup %2239 }
 0x10b   :  { %2245 = vrcp.f32 %v248_v16  ;;  %v2242_v20 = vpop.eup %2241  ;;  %v255_v23 = vadd.f32 1.0, %v2240_v19 }
 0x10d   :  { %2247 = vrcp.f32 %v255_v23 }
 0x114   :  { %v2244_v21 = vpop.eup %2243 }
 0x115   :  { %v2246_v28 = vpop.eup %2245  ;;  %v259_v29 = vmul.f32 %v2244_v21, %v2242_v20 }
 0x116   :  { %v258_v34 = vmul.f32 0.0, %v2246_v28 }
 0x117   :  { %v2248_v36 = vpop.eup %2247 }
 0x118   :  { %v2731_v35 = vadd.f32 %v259_v29, %v258_v34 }
 0x11a   :  { %2249 = vtanh.f32 %v2731_v35 }
 0x124   :  { %v2250_v38 = vpop.eup %2249 }
 0x125   :  { %v262_v43 = vmul.f32 %v2250_v38, %v2248_v36 }
 0x127   :  { %333 = vmatmul.mubr.f32.vlgmr.msra.gmra.mrb[2].mxu0 %v262_v43  ;;  %404 = vmatmul.mubr.f32.vlgmr.msra.gmra.mrb[2].mxu1 %v262_v43 }
 0x128   :  { %1827 = vmatpush1.bf16.msra.mxu0 %v2413_v8  ;;  %1859 = vmatpush1.bf16.msra.mxu1 %v2462_v25 }
 0x129   :  { %1829 = vmatprep.subr.bf16.mxu0 %v2415_v9  ;;  %1861 = vmatprep.subr.bf16.mxu1 %v2487_v33 }
 0x12a   :  { %507 = vmatprep.mubr.f32.mxu0 %v2363_v3  ;;  %578 = vmatprep.mubr.f32.mxu1 %v2363_v3 }
 0x12c   :  { %1831 = vmatpush1.bf16.msra.mxu0 %v2431_v14  ;;  %1863 = vmatpush1.bf16.msra.mxu1 %v2498_v37 }
 0x12d   :  { %1833 = vmatprep.subr.bf16.mxu0 %v2440_v17  ;;  %1865 = vmatprep.subr.bf16.mxu1 %v2522_v45 }
 0x130   :  { %1835 = vmatpush1.bf16.msra.mxu0 %v2465_v26  ;;  %1867 = vmatpush1.bf16.msra.mxu1 %v2531_v48 }
 0x131   :  { %1837 = vmatprep.subr.bf16.mxu0 %v2478_v30  ;;  %1869 = vmatprep.subr.bf16.mxu1 %v2543_v52 }
 0x134   :  { %1839 = vmatpush1.bf16.msra.mxu0 %v2514_v42  ;;  %1871 = vmatpush1.bf16.msra.mxu1 %v2573_v62 }
 0x135   :  { %1841 = vmatprep.subr.bf16.mxu0 %v2525_v46  ;;  %1873 = vmatprep.subr.bf16.mxu1 %v2579_v0 }
 0x138   :  { %1843 = vmatpush1.bf16.msra.mxu0 %v2552_v55  ;;  %1875 = vmatpush1.bf16.msra.mxu1 %v2609_v15 }
 0x139   :  { %1845 = vmatprep.subr.bf16.mxu0 %v2561_v58  ;;  %1877 = vmatprep.subr.bf16.mxu1 %v2615_v18 }
 0x13c   :  { %1847 = vmatpush1.bf16.msra.mxu0 %v2594_v7  ;;  %1879 = vmatpush1.bf16.msra.mxu1 %v2642_v31 }
 0x13d   :  { %1849 = vmatprep.subr.bf16.mxu0 %v2597_v10  ;;  %1881 = vmatprep.subr.bf16.mxu1 %v2645_v32 }
 0x140   :  { %1851 = vmatpush1.bf16.msra.mxu0 %v2630_v24  ;;  %1883 = vmatpush1.bf16.msra.mxu1 %v2664_v40 }
 0x141   :  { %1853 = vmatprep.subr.bf16.mxu0 %v2633_v27  ;;  %1885 = vmatprep.subr.bf16.mxu1 %v2667_v41 }
 0x144   :  { %1855 = vmatpush1.bf16.msra.mxu0 %v2660_v39  ;;  %1887 = vmatpush1.bf16.msra.mxu1 %v2677_v47 }
 0x145   :  { %1889 = vmatprep.subr.bf16.mxu0 %v2402_v4  ;;  %1921 = vmatprep.subr.bf16.mxu1 %v2454_v22 }
 0x1fa   :  { %v334_v50 = vpop.f32.mrb[2].mxu0  ;;  %v405_v51 = vpop.f32.mrb[2].mxu1 }
 0x1fb   :  { %v410_v53 = vadd.f32 %v1594_v44, %v334_v50  ;;  %v336_v54 = vpop.f32.mrb[3].mxu0  ;;  %v407_v56 = vpop.f32.mrb[3].mxu1  ;;  %v412_v5 = vadd.f32 %v1596_v1, %v405_v51  ;;  %v1602_v44 = vld [vmem:[%s3101_s0 + $0x48] sm:$0xff] }
 0x1fc   :  { %v411_v57 = vadd.f32 %v1595_v49, %v336_v54  ;;  %v413_v63 = vadd.f32 %v1597_v61, %v407_v56 }
 0x1fd   :  { %v1598_v59 = vmul.f32 -1.442695, %v410_v53 }
 0x1fe   :  { %v1599_v60 = vmul.f32 -1.442695, %v411_v57  ;;  %v1600_v2 = vmul.f32 -1.442695, %v413_v63  ;;  %v1603_v63 = vld [vmem:[%s3101_s0 + $0x50] sm:$0xff] }
 0x1ff   :  { %2251 = vpow2.f32 %v1598_v59 }
 0x200   :  { %2253 = vpow2.f32 %v1599_v60  ;;  %v1604_v60 = vld [vmem:[%s3101_s0 + $0x58] sm:$0xff] }
 0x201   :  { %2255 = vpow2.f32 %v1600_v2 }
 0x202   :  { %2257 = vtanh.f32 %v412_v5 }
 0x209   :  { %v2252_v6 = vpop.eup %2251 }
 0x20a   :  { %v2254_v11 = vpop.eup %2253  ;;  %v417_v12 = vadd.f32 1.0, %v2252_v6 }
 0x20b   :  { %v423_v13 = vadd.f32 1.0, %v2254_v11  ;;  %v2256_v16 = vpop.eup %2255 }
 0x20c   :  { %2259 = vrcp.f32 %v417_v12  ;;  %v2258_v19 = vpop.eup %2257  ;;  %v430_v28 = vadd.f32 1.0, %v2256_v16 }
 0x20d   :  { %2261 = vrcp.f32 %v423_v13 }
 0x20e   :  { %2263 = vrcp.f32 %v430_v28 }
 0x216   :  { %v2260_v20 = vpop.eup %2259 }
 0x217   :  { %v2262_v21 = vpop.eup %2261  ;;  %v434_v23 = vmul.f32 %v2260_v20, %v2258_v19 }
 0x218   :  { %v433_v29 = vmul.f32 %v2262_v21, %v2731_v35  ;;  %v2264_v36 = vpop.eup %2263  ;;  %v1601_v35 = vld [vmem:[%s3101_s0 + $0x40] sm:$0xff] }
 0x21a   :  { %v2781_v34 = vadd.f32 %v434_v23, %v433_v29 }
 0x21c   :  { %2265 = vtanh.f32 %v2781_v34 }
 0x226   :  { %v2266_v38 = vpop.eup %2265 }
 0x227   :  { %v437_v43 = vmul.f32 %v2266_v38, %v2264_v36 }
 0x229   :  { %508 = vmatmul.mubr.f32.vlgmr.msra.gmra.mrb[4].mxu0 %v437_v43  ;;  %579 = vmatmul.mubr.f32.vlgmr.msra.gmra.mrb[4].mxu1 %v437_v43 }
 0x22a   :  { %1891 = vmatpush1.bf16.msra.mxu0 %v2413_v8  ;;  %1923 = vmatpush1.bf16.msra.mxu1 %v2462_v25 }
 0x22b   :  { %1893 = vmatprep.subr.bf16.mxu0 %v2415_v9  ;;  %1925 = vmatprep.subr.bf16.mxu1 %v2487_v33 }
 0x22c   :  { %682 = vmatprep.mubr.f32.mxu0 %v2363_v3  ;;  %753 = vmatprep.mubr.f32.mxu1 %v2363_v3 }
 0x22e   :  { %1895 = vmatpush1.bf16.msra.mxu0 %v2431_v14  ;;  %1927 = vmatpush1.bf16.msra.mxu1 %v2498_v37 }
 0x22f   :  { %1897 = vmatprep.subr.bf16.mxu0 %v2440_v17  ;;  %1929 = vmatprep.subr.bf16.mxu1 %v2522_v45 }
 0x232   :  { %1899 = vmatpush1.bf16.msra.mxu0 %v2465_v26  ;;  %1931 = vmatpush1.bf16.msra.mxu1 %v2531_v48 }
 0x233   :  { %1901 = vmatprep.subr.bf16.mxu0 %v2478_v30  ;;  %1933 = vmatprep.subr.bf16.mxu1 %v2543_v52 }
 0x236   :  { %1903 = vmatpush1.bf16.msra.mxu0 %v2514_v42  ;;  %1935 = vmatpush1.bf16.msra.mxu1 %v2573_v62 }
 0x237   :  { %1905 = vmatprep.subr.bf16.mxu0 %v2525_v46  ;;  %1937 = vmatprep.subr.bf16.mxu1 %v2579_v0 }
 0x23a   :  { %1907 = vmatpush1.bf16.msra.mxu0 %v2552_v55  ;;  %1939 = vmatpush1.bf16.msra.mxu1 %v2609_v15 }
 0x23b   :  { %1909 = vmatprep.subr.bf16.mxu0 %v2561_v58  ;;  %1941 = vmatprep.subr.bf16.mxu1 %v2615_v18 }
 0x23e   :  { %1911 = vmatpush1.bf16.msra.mxu0 %v2594_v7  ;;  %1943 = vmatpush1.bf16.msra.mxu1 %v2642_v31 }
 0x23f   :  { %1913 = vmatprep.subr.bf16.mxu0 %v2597_v10  ;;  %1945 = vmatprep.subr.bf16.mxu1 %v2645_v32 }
 0x242   :  { %1915 = vmatpush1.bf16.msra.mxu0 %v2630_v24  ;;  %1947 = vmatpush1.bf16.msra.mxu1 %v2664_v40 }
 0x243   :  { %1917 = vmatprep.subr.bf16.mxu0 %v2633_v27  ;;  %1949 = vmatprep.subr.bf16.mxu1 %v2667_v41 }
 0x246   :  { %1919 = vmatpush1.bf16.msra.mxu0 %v2660_v39  ;;  %1951 = vmatpush1.bf16.msra.mxu1 %v2677_v47 }
 0x247   :  { %1953 = vmatprep.subr.bf16.mxu0 %v2402_v4  ;;  %1985 = vmatprep.subr.bf16.mxu1 %v2454_v22 }
 0x2fc   :  { %v509_v49 = vpop.f32.mrb[4].mxu0  ;;  %v580_v50 = vpop.f32.mrb[4].mxu1 }
 0x2fd   :  { %v585_v51 = vadd.f32 %v1601_v35, %v509_v49  ;;  %v511_v53 = vpop.f32.mrb[5].mxu0  ;;  %v582_v54 = vpop.f32.mrb[5].mxu1  ;;  %v587_v2 = vadd.f32 %v1603_v63, %v580_v50  ;;  %v1609_v35 = vld [vmem:[%s3101_s0 + $0x68] sm:$0xff] }
 0x2fe   :  { %v586_v56 = vadd.f32 %v1602_v44, %v511_v53  ;;  %v588_v61 = vadd.f32 %v1604_v60, %v582_v54 }
 0x2ff   :  { %v1605_v57 = vmul.f32 -1.442695, %v585_v51 }
 0x300   :  { %v1606_v59 = vmul.f32 -1.442695, %v586_v56  ;;  %v1607_v1 = vmul.f32 -1.442695, %v588_v61  ;;  %v1610_v61 = vld [vmem:[%s3101_s0 + $0x70] sm:$0xff] }
 0x301   :  { %2267 = vpow2.f32 %v1605_v57 }
 0x302   :  { %2269 = vpow2.f32 %v1606_v59  ;;  %v1611_v59 = vld [vmem:[%s3101_s0 + $0x78] sm:$0xff] }
 0x303   :  { %2271 = vpow2.f32 %v1607_v1 }
 0x304   :  { %2273 = vtanh.f32 %v587_v2 }
 0x30b   :  { %v2268_v5 = vpop.eup %2267 }
 0x30c   :  { %v2270_v6 = vpop.eup %2269  ;;  %v592_v11 = vadd.f32 1.0, %v2268_v5 }
 0x30d   :  { %v598_v12 = vadd.f32 1.0, %v2270_v6  ;;  %v2272_v13 = vpop.eup %2271 }
 0x30e   :  { %2275 = vrcp.f32 %v592_v11  ;;  %v2274_v16 = vpop.eup %2273  ;;  %v605_v23 = vadd.f32 1.0, %v2272_v13 }
 0x30f   :  { %2277 = vrcp.f32 %v598_v12 }
 0x310   :  { %2279 = vrcp.f32 %v605_v23 }
 0x318   :  { %v2276_v19 = vpop.eup %2275 }
 0x319   :  { %v2278_v20 = vpop.eup %2277  ;;  %v609_v21 = vmul.f32 %v2276_v19, %v2274_v16 }
 0x31a   :  { %v608_v28 = vmul.f32 %v2278_v20, %v2781_v34  ;;  %v2280_v36 = vpop.eup %2279  ;;  %v1608_v34 = vld [vmem:[%s3101_s0 + $0x60] sm:$0xff] }
 0x31c   :  { %v2831_v29 = vadd.f32 %v609_v21, %v608_v28 }
 0x31e   :  { %2281 = vtanh.f32 %v2831_v29 }
 0x328   :  { %v2282_v38 = vpop.eup %2281 }
 0x329   :  { %v612_v43 = vmul.f32 %v2282_v38, %v2280_v36 }
 0x32b   :  { %683 = vmatmul.mubr.f32.vlgmr.msra.gmra.mrb[6].mxu0 %v612_v43  ;;  %754 = vmatmul.mubr.f32.vlgmr.msra.gmra.mrb[6].mxu1 %v612_v43 }
 0x32c   :  { %1955 = vmatpush1.bf16.msra.mxu0 %v2413_v8  ;;  %1987 = vmatpush1.bf16.msra.mxu1 %v2462_v25 }
 0x32d   :  { %1957 = vmatprep.subr.bf16.mxu0 %v2415_v9  ;;  %1989 = vmatprep.subr.bf16.mxu1 %v2487_v33 }
 0x32e   :  { %857 = vmatprep.mubr.f32.mxu0 %v2363_v3  ;;  %928 = vmatprep.mubr.f32.mxu1 %v2363_v3 }
 0x330   :  { %1959 = vmatpush1.bf16.msra.mxu0 %v2431_v14  ;;  %1991 = vmatpush1.bf16.msra.mxu1 %v2498_v37 }
 0x331   :  { %1961 = vmatprep.subr.bf16.mxu0 %v2440_v17  ;;  %1993 = vmatprep.subr.bf16.mxu1 %v2522_v45 }
 0x334   :  { %1963 = vmatpush1.bf16.msra.mxu0 %v2465_v26  ;;  %1995 = vmatpush1.bf16.msra.mxu1 %v2531_v48 }
 0x335   :  { %1965 = vmatprep.subr.bf16.mxu0 %v2478_v30  ;;  %1997 = vmatprep.subr.bf16.mxu1 %v2543_v52 }
 0x338   :  { %1967 = vmatpush1.bf16.msra.mxu0 %v2514_v42  ;;  %1999 = vmatpush1.bf16.msra.mxu1 %v2573_v62 }
 0x339   :  { %1969 = vmatprep.subr.bf16.mxu0 %v2525_v46  ;;  %2001 = vmatprep.subr.bf16.mxu1 %v2579_v0 }
 0x33c   :  { %1971 = vmatpush1.bf16.msra.mxu0 %v2552_v55  ;;  %2003 = vmatpush1.bf16.msra.mxu1 %v2609_v15 }
 0x33d   :  { %1973 = vmatprep.subr.bf16.mxu0 %v2561_v58  ;;  %2005 = vmatprep.subr.bf16.mxu1 %v2615_v18 }
 0x340   :  { %1975 = vmatpush1.bf16.msra.mxu0 %v2594_v7  ;;  %2007 = vmatpush1.bf16.msra.mxu1 %v2642_v31 }
 0x341   :  { %1977 = vmatprep.subr.bf16.mxu0 %v2597_v10  ;;  %2009 = vmatprep.subr.bf16.mxu1 %v2645_v32 }
 0x344   :  { %1979 = vmatpush1.bf16.msra.mxu0 %v2630_v24  ;;  %2011 = vmatpush1.bf16.msra.mxu1 %v2664_v40 }
 0x345   :  { %1981 = vmatprep.subr.bf16.mxu0 %v2633_v27  ;;  %2013 = vmatprep.subr.bf16.mxu1 %v2667_v41 }
 0x348   :  { %1983 = vmatpush1.bf16.msra.mxu0 %v2660_v39  ;;  %2015 = vmatpush1.bf16.msra.mxu1 %v2677_v47 }
 0x349   :  { %2017 = vmatprep.subr.bf16.mxu0 %v2402_v4  ;;  %2049 = vmatprep.subr.bf16.mxu1 %v2454_v22 }
 0x3fe   :  { %v684_v44 = vpop.f32.mrb[6].mxu0  ;;  %v755_v49 = vpop.f32.mrb[6].mxu1 }
 0x3ff   :  { %v760_v50 = vadd.f32 %v1608_v34, %v684_v44  ;;  %v686_v51 = vpop.f32.mrb[7].mxu0  ;;  %v757_v53 = vpop.f32.mrb[7].mxu1  ;;  %v762_v1 = vadd.f32 %v1610_v61, %v755_v49  ;;  %v1616_v34 = vld [vmem:[%s3101_s0 + $0x88] sm:$0xff] }
 0x400   :  { %v761_v54 = vadd.f32 %v1609_v35, %v686_v51  ;;  %v763_v60 = vadd.f32 %v1611_v59, %v757_v53 }
 0x401   :  { %v1612_v56 = vmul.f32 -1.442695, %v760_v50 }
 0x402   :  { %v1613_v57 = vmul.f32 -1.442695, %v761_v54  ;;  %v1614_v63 = vmul.f32 -1.442695, %v763_v60  ;;  %v1617_v60 = vld [vmem:[%s3101_s0 + $0x90] sm:$0xff] }
 0x403   :  { %2283 = vpow2.f32 %v1612_v56 }
 0x404   :  { %2285 = vpow2.f32 %v1613_v57  ;;  %v1618_v57 = vld [vmem:[%s3101_s0 + $0x98] sm:$0xff] }
 0x405   :  { %2287 = vpow2.f32 %v1614_v63 }
 0x406   :  { %2289 = vtanh.f32 %v762_v1 }
 0x40d   :  { %v2284_v2 = vpop.eup %2283 }
 0x40e   :  { %v2286_v5 = vpop.eup %2285  ;;  %v767_v6 = vadd.f32 1.0, %v2284_v2 }
 0x40f   :  { %v773_v11 = vadd.f32 1.0, %v2286_v5  ;;  %v2288_v12 = vpop.eup %2287 }
 0x410   :  { %2291 = vrcp.f32 %v767_v6  ;;  %v2290_v13 = vpop.eup %2289  ;;  %v780_v21 = vadd.f32 1.0, %v2288_v12 }
 0x411   :  { %2293 = vrcp.f32 %v773_v11 }
 0x412   :  { %2295 = vrcp.f32 %v780_v21 }
 0x41a   :  { %v2292_v16 = vpop.eup %2291 }
 0x41b   :  { %v2294_v19 = vpop.eup %2293  ;;  %v784_v20 = vmul.f32 %v2292_v16, %v2290_v13 }
 0x41c   :  { %v783_v23 = vmul.f32 %v2294_v19, %v2831_v29  ;;  %v2296_v36 = vpop.eup %2295  ;;  %v1615_v29 = vld [vmem:[%s3101_s0 + $0x80] sm:$0xff] }
 0x41e   :  { %v2881_v28 = vadd.f32 %v784_v20, %v783_v23 }
 0x420   :  { %2297 = vtanh.f32 %v2881_v28 }
 0x42a   :  { %v2298_v38 = vpop.eup %2297 }
 0x42b   :  { %v787_v43 = vmul.f32 %v2298_v38, %v2296_v36 }
 0x42d   :  { %858 = vmatmul.mubr.f32.vlgmr.msra.gmra.mrb[8].mxu0 %v787_v43  ;;  %929 = vmatmul.mubr.f32.vlgmr.msra.gmra.mrb[8].mxu1 %v787_v43 }
 0x42e   :  { %2019 = vmatpush1.bf16.msra.mxu0 %v2413_v8  ;;  %2051 = vmatpush1.bf16.msra.mxu1 %v2462_v25 }
 0x42f   :  { %2021 = vmatprep.subr.bf16.mxu0 %v2415_v9  ;;  %2053 = vmatprep.subr.bf16.mxu1 %v2487_v33 }
 0x430   :  { %1032 = vmatprep.mubr.f32.mxu0 %v2363_v3  ;;  %1103 = vmatprep.mubr.f32.mxu1 %v2363_v3 }
 0x432   :  { %2023 = vmatpush1.bf16.msra.mxu0 %v2431_v14  ;;  %2055 = vmatpush1.bf16.msra.mxu1 %v2498_v37 }
 0x433   :  { %2025 = vmatprep.subr.bf16.mxu0 %v2440_v17  ;;  %2057 = vmatprep.subr.bf16.mxu1 %v2522_v45 }
 0x436   :  { %2027 = vmatpush1.bf16.msra.mxu0 %v2465_v26  ;;  %2059 = vmatpush1.bf16.msra.mxu1 %v2531_v48 }
 0x437   :  { %2029 = vmatprep.subr.bf16.mxu0 %v2478_v30  ;;  %2061 = vmatprep.subr.bf16.mxu1 %v2543_v52 }
 0x43a   :  { %2031 = vmatpush1.bf16.msra.mxu0 %v2514_v42  ;;  %2063 = vmatpush1.bf16.msra.mxu1 %v2573_v62 }
 0x43b   :  { %2033 = vmatprep.subr.bf16.mxu0 %v2525_v46  ;;  %2065 = vmatprep.subr.bf16.mxu1 %v2579_v0 }
 0x43e   :  { %2035 = vmatpush1.bf16.msra.mxu0 %v2552_v55  ;;  %2067 = vmatpush1.bf16.msra.mxu1 %v2609_v15 }
 0x43f   :  { %2037 = vmatprep.subr.bf16.mxu0 %v2561_v58  ;;  %2069 = vmatprep.subr.bf16.mxu1 %v2615_v18 }
 0x442   :  { %2039 = vmatpush1.bf16.msra.mxu0 %v2594_v7  ;;  %2071 = vmatpush1.bf16.msra.mxu1 %v2642_v31 }
 0x443   :  { %2041 = vmatprep.subr.bf16.mxu0 %v2597_v10  ;;  %2073 = vmatprep.subr.bf16.mxu1 %v2645_v32 }
 0x446   :  { %2043 = vmatpush1.bf16.msra.mxu0 %v2630_v24  ;;  %2075 = vmatpush1.bf16.msra.mxu1 %v2664_v40 }
 0x447   :  { %2045 = vmatprep.subr.bf16.mxu0 %v2633_v27  ;;  %2077 = vmatprep.subr.bf16.mxu1 %v2667_v41 }
 0x44a   :  { %2047 = vmatpush1.bf16.msra.mxu0 %v2660_v39  ;;  %2079 = vmatpush1.bf16.msra.mxu1 %v2677_v47 }
 0x44b   :  { %2081 = vmatprep.subr.bf16.mxu0 %v2402_v4  ;;  %2113 = vmatprep.subr.bf16.mxu1 %v2454_v22 }
 0x500   :  { %v859_v35 = vpop.f32.mrb[8].mxu0  ;;  %v930_v44 = vpop.f32.mrb[8].mxu1 }
 0x501   :  { %v935_v49 = vadd.f32 %v1615_v29, %v859_v35  ;;  %v861_v50 = vpop.f32.mrb[9].mxu0  ;;  %v932_v51 = vpop.f32.mrb[9].mxu1  ;;  %v937_v63 = vadd.f32 %v1617_v60, %v930_v44  ;;  %v1623_v29 = vld [vmem:[%s3101_s0 + $0xa8] sm:$0xff] }
 0x502   :  { %v936_v53 = vadd.f32 %v1616_v34, %v861_v50  ;;  %v938_v59 = vadd.f32 %v1618_v57, %v932_v51 }
 0x503   :  { %v1619_v54 = vmul.f32 -1.442695, %v935_v49 }
 0x504   :  { %v1620_v56 = vmul.f32 -1.442695, %v936_v53  ;;  %v1621_v61 = vmul.f32 -1.442695, %v938_v59 }
 0x505   :  { %2299 = vpow2.f32 %v1619_v54 }
 0x506   :  { %2301 = vpow2.f32 %v1620_v56  ;;  %v1624_v56 = vld [vmem:[%s3101_s0 + $0xb0] sm:$0xff] }
 0x507   :  { %2303 = vpow2.f32 %v1621_v61 }
 0x508   :  { %2305 = vtanh.f32 %v937_v63 }
 0x50f   :  { %v2300_v1 = vpop.eup %2299 }
 0x510   :  { %v2302_v2 = vpop.eup %2301  ;;  %v942_v5 = vadd.f32 1.0, %v2300_v1 }
 0x511   :  { %v948_v6 = vadd.f32 1.0, %v2302_v2  ;;  %v2304_v11 = vpop.eup %2303 }
 0x512   :  { %2307 = vrcp.f32 %v942_v5  ;;  %v2306_v12 = vpop.eup %2305  ;;  %v955_v20 = vadd.f32 1.0, %v2304_v11 }
 0x513   :  { %2309 = vrcp.f32 %v948_v6 }
 0x514   :  { %2311 = vrcp.f32 %v955_v20 }
 0x51c   :  { %v2308_v13 = vpop.eup %2307 }
 0x51d   :  { %v2310_v16 = vpop.eup %2309  ;;  %v959_v19 = vmul.f32 %v2308_v13, %v2306_v12 }
 0x51e   :  { %v958_v21 = vmul.f32 %v2310_v16, %v2881_v28  ;;  %v2312_v36 = vpop.eup %2311  ;;  %v1622_v28 = vld [vmem:[%s3101_s0 + $0xa0] sm:$0xff] }
 0x520   :  { %v2931_v23 = vadd.f32 %v959_v19, %v958_v21 }
 0x522   :  { %2313 = vtanh.f32 %v2931_v23 }
 0x52c   :  { %v2314_v38 = vpop.eup %2313 }
 0x52d   :  { %v962_v43 = vmul.f32 %v2314_v38, %v2312_v36  ;;  %v1494_v38 = vld [vmem:[%s3102_s2 + $0x8] sm:$0xff] }
 0x52f   :  { %1033 = vmatmul.mubr.f32.vlgmr.msra.gmra.mrb[10].mxu0 %v962_v43  ;;  %1104 = vmatmul.mubr.f32.vlgmr.msra.gmra.mrb[10].mxu1 %v962_v43 }
 0x530   :  { %2083 = vmatpush1.bf16.msra.mxu0 %v2413_v8  ;;  %2115 = vmatpush1.bf16.msra.mxu1 %v2462_v25 }
 0x531   :  { %2085 = vmatprep.subr.bf16.mxu0 %v2415_v9  ;;  %2117 = vmatprep.subr.bf16.mxu1 %v2487_v33 }
 0x532   :  { %1207 = vmatprep.mubr.f32.mxu0 %v2363_v3  ;;  %1278 = vmatprep.mubr.f32.mxu1 %v2363_v3 }
 0x534   :  { %2087 = vmatpush1.bf16.msra.mxu0 %v2431_v14  ;;  %2119 = vmatpush1.bf16.msra.mxu1 %v2498_v37 }
 0x535   :  { %2089 = vmatprep.subr.bf16.mxu0 %v2440_v17  ;;  %2121 = vmatprep.subr.bf16.mxu1 %v2522_v45 }
 0x538   :  { %2091 = vmatpush1.bf16.msra.mxu0 %v2465_v26  ;;  %2123 = vmatpush1.bf16.msra.mxu1 %v2531_v48 }
 0x539   :  { %2093 = vmatprep.subr.bf16.mxu0 %v2478_v30  ;;  %2125 = vmatprep.subr.bf16.mxu1 %v2543_v52 }
 0x53c   :  { %2095 = vmatpush1.bf16.msra.mxu0 %v2514_v42  ;;  %2127 = vmatpush1.bf16.msra.mxu1 %v2573_v62 }
 0x53d   :  { %2097 = vmatprep.subr.bf16.mxu0 %v2525_v46  ;;  %2129 = vmatprep.subr.bf16.mxu1 %v2579_v0 }
 0x540   :  { %2099 = vmatpush1.bf16.msra.mxu0 %v2552_v55  ;;  %2131 = vmatpush1.bf16.msra.mxu1 %v2609_v15 }
 0x541   :  { %2101 = vmatprep.subr.bf16.mxu0 %v2561_v58  ;;  %2133 = vmatprep.subr.bf16.mxu1 %v2615_v18 }
 0x544   :  { %2103 = vmatpush1.bf16.msra.mxu0 %v2594_v7  ;;  %2135 = vmatpush1.bf16.msra.mxu1 %v2642_v31 }
 0x545   :  { %2105 = vmatprep.subr.bf16.mxu0 %v2597_v10  ;;  %2137 = vmatprep.subr.bf16.mxu1 %v2645_v32 }
 0x548   :  { %2107 = vmatpush1.bf16.msra.mxu0 %v2630_v24  ;;  %2139 = vmatpush1.bf16.msra.mxu1 %v2664_v40 }
 0x549   :  { %2109 = vmatprep.subr.bf16.mxu0 %v2633_v27  ;;  %2141 = vmatprep.subr.bf16.mxu1 %v2667_v41 }
 0x54c   :  { %2111 = vmatpush1.bf16.msra.mxu0 %v2660_v39  ;;  %2143 = vmatpush1.bf16.msra.mxu1 %v2677_v47 }
 0x54d   :  { %2145 = vmatprep.subr.bf16.mxu0 %v2402_v4  ;;  %2177 = vmatprep.subr.bf16.mxu1 %v2454_v22  ;;  %v1625_v4 = vld [vmem:[%s3101_s0 + $0xb8] sm:$0xff] }
 0x602   :  { %v1034_v34 = vpop.f32.mrb[10].mxu0  ;;  %v1105_v35 = vpop.f32.mrb[10].mxu1 }
 0x603   :  { %v1110_v44 = vadd.f32 %v1622_v28, %v1034_v34  ;;  %v1036_v49 = vpop.f32.mrb[11].mxu0  ;;  %v1107_v50 = vpop.f32.mrb[11].mxu1  ;;  %v1112_v59 = vadd.f32 %v1624_v56, %v1105_v35  ;;  %v2364_v28 = vmov 0.0|0.0   ;;  %v1496_v34 = vld [vmem:[%s3102_s2 + $0x18] sm:$0xff] }
 0x604   :  { %v1111_v51 = vadd.f32 %v1623_v29, %v1036_v49  ;;  %v1113_v22 = vadd.f32 %v1625_v4, %v1107_v50  ;;  %v1495_v29 = vld [vmem:[%s3102_s2 + $0x10] sm:$0xff]  ;;  %v1498_v49 = vld [vmem:[%s3102_s2 + $0x28] sm:$0xff]  ;;  %v1501_v4 = vld [vmem:[%s3102_s2 + $0x40] sm:$0xff] }
 0x605   :  { %v1626_v53 = vmul.f32 -1.442695, %v1110_v44  ;;  %v2212_v35 = vpack.c.bf16 %v1496_v34, %v1495_v29  ;;  %v1497_v44 = vld [vmem:[%s3102_s2 + $0x20] sm:$0xff] }
 0x606   :  { %v1627_v54 = vmul.f32 -1.442695, %v1111_v51  ;;  %v1628_v57 = vmul.f32 -1.442695, %v1113_v22  ;;  %v2215_v50 = vpack.c.bf16 %v1498_v49, %v1497_v44  ;;  %v1499_v51 = vld [vmem:[%s3102_s2 + $0x30] sm:$0xff]  ;;  %v1502_v22 = vld [vmem:[%s3102_s2 + $0x48] sm:$0xff] }
 0x607   :  { %2315 = vpow2.f32 %v1626_v53  ;;  %v1500_v53 = vld [vmem:[%s3102_s2 + $0x38] sm:$0xff]  ;;  %v2221_v56 = vpack.c.bf16 %v1502_v22, %v1501_v4 }
 0x608   :  { %2317 = vpow2.f32 %v1627_v54  ;;  %v2218_v54 = vpack.c.bf16 %v1500_v53, %v1499_v51 }
 0x609   :  { %2319 = vpow2.f32 %v1628_v57  ;;  %v1503_v57 = vld [vmem:[%s3102_s2 + $0x50] sm:$0xff] }
 0x60a   :  { %2321 = vtanh.f32 %v1112_v59  ;;  %v1504_v59 = vld [vmem:[%s3102_s2 + $0x58] sm:$0xff] }
 0x611   :  { %v2316_v60 = vpop.eup %2315 }
 0x612   :  { %v2318_v61 = vpop.eup %2317  ;;  %v1117_v63 = vadd.f32 1.0, %v2316_v60  ;;  %v1505_v60 = vld [vmem:[%s3102_s2 + $0x60] sm:$0xff] }
 0x613   :  { %v1123_v1 = vadd.f32 1.0, %v2318_v61  ;;  %v2320_v2 = vpop.eup %2319  ;;  %v2224_v61 = vpack.c.bf16 %v1504_v59, %v1503_v57 }
 0x614   :  { %2323 = vrcp.f32 %v1117_v63  ;;  %v2322_v5 = vpop.eup %2321  ;;  %v1130_v13 = vadd.f32 1.0, %v2320_v2  ;;  %v1506_v63 = vld [vmem:[%s3102_s2 + $0x68] sm:$0xff]  ;;  %v1507_v2 = vld [vmem:[%s3102_s2 + $0x70] sm:$0xff] }
 0x615   :  { %2325 = vrcp.f32 %v1123_v1  ;;  %v2227_v1 = vpack.c.bf16 %v1506_v63, %v1505_v60 }
 0x616   :  { %2327 = vrcp.f32 %v1130_v13 }
 0x61e   :  { %v2324_v6 = vpop.eup %2323 }
 0x61f   :  { %v2326_v11 = vpop.eup %2325  ;;  %v1134_v12 = vmul.f32 %v2324_v6, %v2322_v5  ;;  %v1508_v5 = vld [vmem:[%s3102_s2 + $0x78] sm:$0xff] }
 0x620   :  { %v1133_v16 = vmul.f32 %v2326_v11, %v2931_v23  ;;  %v2328_v20 = vpop.eup %2327  ;;  %v1493_v23 = vld [vmem:[%s3102_s2] sm:$0xff]  ;;  %v2230_v6 = vpack.c.bf16 %v1508_v5, %v1507_v2 }
 0x621   :  { %v2209_v43 = vpack.c.bf16 %v1494_v38, %v1493_v23  ;;  %v1636_v11 = vld [vmem:[%s3101_s0 + $0xe0] sm:$0xff] }
 0x622   :  { %v2981_v19 = vadd.f32 %v1134_v12, %v1133_v16 }
 0x624   :  { %2329 = vtanh.f32 %v2981_v19 }
 0x62e   :  { %v2330_v21 = vpop.eup %2329 }
 0x62f   :  { %v1137_v36 = vmul.f32 %v2330_v21, %v2328_v20 }
 0x631   :  { %1208 = vmatmul.mubr.f32.vlgmr.msra.gmra.mrb[12].mxu0 %v1137_v36  ;;  %1279 = vmatmul.mubr.f32.vlgmr.msra.gmra.mrb[12].mxu1 %v1137_v36 }
 0x632   :  { %2147 = vmatpush1.bf16.msra.mxu0 %v2413_v8  ;;  %2179 = vmatpush1.bf16.msra.mxu1 %v2462_v25  ;;  %v1629_v8 = vld [vmem:[%s3101_s0 + $0xc0] sm:$0xff] }
 0x633   :  { %2149 = vmatprep.subr.bf16.mxu0 %v2415_v9  ;;  %2181 = vmatprep.subr.bf16.mxu1 %v2487_v33  ;;  %v1630_v9 = vld [vmem:[%s3101_s0 + $0xc8] sm:$0xff] }
 0x634   :  { %1382 = vmatprep.mubr.f32.mxu0 %v2363_v3  ;;  %1453 = vmatprep.mubr.f32.mxu1 %v2363_v3 }
 0x636   :  { %2151 = vmatpush1.bf16.msra.mxu0 %v2431_v14  ;;  %2183 = vmatpush1.bf16.msra.mxu1 %v2498_v37 }
 0x637   :  { %2153 = vmatprep.subr.bf16.mxu0 %v2440_v17  ;;  %2185 = vmatprep.subr.bf16.mxu1 %v2522_v45  ;;  %v1632_v45 = vld [vmem:[%s3101_s0 + $0xd8] sm:$0xff] }
 0x63a   :  { %2155 = vmatpush1.bf16.msra.mxu0 %v2465_v26  ;;  %2187 = vmatpush1.bf16.msra.mxu1 %v2531_v48  ;;  %v1631_v48 = vld [vmem:[%s3101_s0 + $0xd0] sm:$0xff] }
 0x63b   :  { %2157 = vmatprep.subr.bf16.mxu0 %v2478_v30  ;;  %2189 = vmatprep.subr.bf16.mxu1 %v2543_v52 }
 0x63e   :  { %2159 = vmatpush1.bf16.msra.mxu0 %v2514_v42  ;;  %2191 = vmatpush1.bf16.msra.mxu1 %v2573_v62 }
 0x63f   :  { %2161 = vmatprep.subr.bf16.mxu0 %v2525_v46  ;;  %2193 = vmatprep.subr.bf16.mxu1 %v2579_v0 }
 0x642   :  { %2163 = vmatpush1.bf16.msra.mxu0 %v2552_v55  ;;  %2195 = vmatpush1.bf16.msra.mxu1 %v2609_v15 }
 0x643   :  { %2165 = vmatprep.subr.bf16.mxu0 %v2561_v58  ;;  %2197 = vmatprep.subr.bf16.mxu1 %v2615_v18 }
 0x646   :  { %2167 = vmatpush1.bf16.msra.mxu0 %v2594_v7  ;;  %2199 = vmatpush1.bf16.msra.mxu1 %v2642_v31 }
 0x647   :  { %2169 = vmatprep.subr.bf16.mxu0 %v2597_v10  ;;  %2201 = vmatprep.subr.bf16.mxu1 %v2645_v32 }
 0x64a   :  { %2171 = vmatpush1.bf16.msra.mxu0 %v2630_v24  ;;  %2203 = vmatpush1.bf16.msra.mxu1 %v2664_v40 }
 0x64b   :  { %2173 = vmatprep.subr.bf16.mxu0 %v2633_v27  ;;  %2205 = vmatprep.subr.bf16.mxu1 %v2667_v41 }
 0x64e   :  { %2175 = vmatpush1.bf16.msra.mxu0 %v2660_v39  ;;  %2207 = vmatpush1.bf16.msra.mxu1 %v2677_v47 }
 0x64f   :  { %2208 = vmatprep.subr.bf16.mxu0 %v2364_v28 }
 0x704   :  { %v1209_v14 = vpop.f32.mrb[12].mxu0  ;;  %v1280_v17 = vpop.f32.mrb[12].mxu1 }
 0x705   :  { %v1285_v25 = vadd.f32 %v1629_v8, %v1209_v14  ;;  %v1211_v26 = vpop.f32.mrb[13].mxu0  ;;  %v1282_v30 = vpop.f32.mrb[13].mxu1  ;;  %v1287_v55 = vadd.f32 %v1631_v48, %v1280_v17  ;;  %v1638_v17 = vld [vmem:[%s3101_s0 + $0xf0] sm:$0xff] }
 0x706   :  { %v1286_v33 = vadd.f32 %v1630_v9, %v1211_v26  ;;  %v1288_v46 = vadd.f32 %v1632_v45, %v1282_v30  ;;  %v1639_v9 = vld [vmem:[%s3101_s0 + $0xf8] sm:$0xff] }
 0x707   :  { %v1633_v37 = vmul.f32 -1.442695, %v1285_v25 }
 0x708   :  { %v1634_v42 = vmul.f32 -1.442695, %v1286_v33  ;;  %v1635_v52 = vmul.f32 -1.442695, %v1288_v46 }
 0x709   :  { %2331 = vpow2.f32 %v1633_v37 }
 0x70a   :  { %2333 = vpow2.f32 %v1634_v42 }
 0x70b   :  { %2335 = vpow2.f32 %v1635_v52 }
 0x70c   :  { %2337 = vtanh.f32 %v1287_v55 }
 0x713   :  { %v2332_v58 = vpop.eup %2331 }
 0x714   :  { %v2334_v62 = vpop.eup %2333  ;;  %v1292_v0 = vadd.f32 1.0, %v2332_v58 }
 0x715   :  { %v1298_v7 = vadd.f32 1.0, %v2334_v62  ;;  %v2336_v10 = vpop.eup %2335 }
 0x716   :  { %2339 = vrcp.f32 %v1292_v0  ;;  %v2338_v15 = vpop.eup %2337  ;;  %v1305_v31 = vadd.f32 1.0, %v2336_v10 }
 0x717   :  { %2341 = vrcp.f32 %v1298_v7 }
 0x718   :  { %2343 = vrcp.f32 %v1305_v31 }
 0x720   :  { %v2340_v18 = vpop.eup %2339 }
 0x721   :  { %v2342_v24 = vpop.eup %2341  ;;  %v1309_v27 = vmul.f32 %v2340_v18, %v2338_v15  ;;  %v1643_v18 = vld [vmem:[%s3103_s3] ss:$0 sm:$0xff] }
 0x722   :  { %v1308_v32 = vmul.f32 %v2342_v24, %v2981_v19  ;;  %v2344_v40 = vpop.eup %2343 }
 0x724   :  { %v3029_v39 = vadd.f32 %v1309_v27, %v1308_v32 }
 0x726   :  { %2345 = vtanh.f32 %v3029_v39 }
 0x730   :  { %v2346_v41 = vpop.eup %2345 }
 0x731   :  { %v1312_v47 = vmul.f32 %v2346_v41, %v2344_v40 }
 0x733   :  { %1383 = vmatmul.mubr.f32.vlgmr.msra.gmra.mrb[14].mxu0 %v1312_v47  ;;  %1454 = vmatmul.mubr.f32.vlgmr.msra.gmra.mrb[14].mxu1 %v1312_v47 }
 0x734   :  { %2210 = vmatpush3.bf16.msra.mxu0 %v2209_v43  ;;  %1693 = vmatprep.mubr.msk.f32.mxu0 %vm2365_vm0, %v2363_v3  ;;  %v1637_v3 = vld [vmem:[%s3101_s0 + $0xe8] sm:$0xff] }
 0x735   :  { %2211 = vmatprep.subr.bf16.mxu0 %v2364_v28 }
 0x738   :  { %2213 = vmatpush3.bf16.msra.mxu0 %v2212_v35 }
 0x739   :  { %2214 = vmatprep.subr.bf16.mxu0 %v2364_v28 }
 0x73c   :  { %2216 = vmatpush3.bf16.msra.mxu0 %v2215_v50 }
 0x73d   :  { %2217 = vmatprep.subr.bf16.mxu0 %v2364_v28 }
 0x740   :  { %2219 = vmatpush3.bf16.msra.mxu0 %v2218_v54 }
 0x741   :  { %2220 = vmatprep.subr.bf16.mxu0 %v2364_v28 }
 0x744   :  { %2222 = vmatpush3.bf16.msra.mxu0 %v2221_v56 }
 0x745   :  { %2223 = vmatprep.subr.bf16.mxu0 %v2364_v28 }
 0x748   :  { %2225 = vmatpush3.bf16.msra.mxu0 %v2224_v61 }
 0x749   :  { %2226 = vmatprep.subr.bf16.mxu0 %v2364_v28 }
 0x74c   :  { %2228 = vmatpush3.bf16.msra.mxu0 %v2227_v1 }
 0x74d   :  { %2229 = vmatprep.subr.bf16.mxu0 %v2364_v28 }
 0x750   :  { %2231 = vmatpush3.bf16.msra.mxu0 %v2230_v6 }
 0x806   :  { %v1384_v12 = vpop.f32.mrb[14].mxu0  ;;  %v1455_v13 = vpop.f32.mrb[14].mxu1 }
 0x807   :  { %v1460_v16 = vadd.f32 %v1636_v11, %v1384_v12  ;;  %v1386_v19 = vpop.f32.mrb[15].mxu0  ;;  %v1457_v20 = vpop.f32.mrb[15].mxu1  ;;  %v1462_v26 = vadd.f32 %v1638_v17, %v1455_v13 }
 0x808   :  { %v1461_v21 = vadd.f32 %v1637_v3, %v1386_v19  ;;  %v1463_v14 = vadd.f32 %v1639_v9, %v1457_v20 }
 0x809   :  { %v1640_v36 = vmul.f32 -1.442695, %v1460_v16 }
 0x80a   :  { %v1641_v8 = vmul.f32 -1.442695, %v1461_v21  ;;  %v1642_v25 = vmul.f32 -1.442695, %v1463_v14 }
 0x80b   :  { %2347 = vpow2.f32 %v1640_v36 }
 0x80c   :  { %2349 = vpow2.f32 %v1641_v8 }
 0x80d   :  { %2351 = vpow2.f32 %v1642_v25 }
 0x80e   :  { %2353 = vtanh.f32 %v1462_v26 }
 0x815   :  { %v2348_v30 = vpop.eup %2347 }
 0x816   :  { %v2350_v33 = vpop.eup %2349  ;;  %v1467_v37 = vadd.f32 1.0, %v2348_v30 }
 0x817   :  { %v1473_v42 = vadd.f32 1.0, %v2350_v33  ;;  %v2352_v45 = vpop.eup %2351 }
 0x818   :  { %2355 = vrcp.f32 %v1467_v37  ;;  %v2354_v46 = vpop.eup %2353  ;;  %v1480_v58 = vadd.f32 1.0, %v2352_v45 }
 0x819   :  { %2357 = vrcp.f32 %v1473_v42 }
 0x81a   :  { %2359 = vrcp.f32 %v1480_v58 }
 0x822   :  { %v2356_v48 = vpop.eup %2355 }
 0x823   :  { %v2358_v52 = vpop.eup %2357  ;;  %v1484_v55 = vmul.f32 %v2356_v48, %v2354_v46 }
 0x824   :  { %v1483_v62 = vmul.f32 %v2358_v52, %v3029_v39  ;;  %v2360_v7 = vpop.eup %2359 }
 0x826   :  { %v1485_v0 = vadd.f32 %v1484_v55, %v1483_v62 }
 0x828   :  { %2361 = vtanh.f32 %v1485_v0 }
 0x832   :  { %v2362_v10 = vpop.eup %2361 }
 0x833   :  { %v1487_v15 = vmul.f32 %v2362_v10, %v2360_v7 }
 0x835   :  { %1694 = vmatmul.mubr.f32.vlgmr.msra.gmra.mrb[16].mxu0 %v1487_v15 }
 0x908   :  { %v1582_v24 = vpop.f32.mrb[16].mxu0 }
 0x909   :  { %v1583_v27 = vadd.f32 %v1643_v18, %v1582_v24  ;;  %v1695_v31 = vpop.f32.mrb[17].mxu0 }
 0x90b   :  { %1586 = vst [vmem:[%s3104_s4] sm:$0xff] %v1583_v27 }

</bundles_post_ra>
